<compile_context>
chip_gen: v7x
topology: tpu7x:2x2x1
jax: 0.10.0
libtpu: 0.0.40
codegen_flags: <defaults>
</compile_context>

<pallas_src>
import math
from functools import partial

import numpy as np
import jax
import jax.numpy as jnp
from jax import lax
from jax.experimental import pallas as pl
from jax.experimental.pallas import tpu as pltpu

_LN2 = math.log(2.0)


# ---------------------------------------------------------------------------
# In-kernel helpers
# ---------------------------------------------------------------------------
def _layernorm(v, g, b, eps=1e-5):
    mu = jnp.mean(v, axis=-1, keepdims=True)
    var = jnp.mean((v - mu) ** 2, axis=-1, keepdims=True)
    return (v - mu) * lax.rsqrt(var + eps) * g + b


def _erf(x):
    # Abramowitz & Stegun 7.1.26 rational approximation of erf (|err| < 1.5e-7).
    # Uses only exp / mul / add / div / where so it lowers on any Mosaic version.
    a1, a2, a3, a4, a5 = 0.254829592, -0.284496736, 1.421413741, -1.453152027, 1.061405429
    p = 0.3275911
    ax = jnp.abs(x)
    t = 1.0 / (1.0 + p * ax)
    poly = ((((a5 * t + a4) * t + a3) * t + a2) * t + a1) * t
    y = 1.0 - poly * jnp.exp(-ax * ax)
    return jnp.where(x >= 0.0, y, -y)


def _gelu_exact(x):
    # torch.nn.GELU() default is the exact (erf) formulation.
    return 0.5 * x * (1.0 + _erf(x * (1.0 / math.sqrt(2.0))))


# ---------------------------------------------------------------------------
# Pallas kernels
# ---------------------------------------------------------------------------
def retblock_kernel(H, DH,
                    x_ref, ln1g, ln1b, wq, wk, wv, cose, sine,
                    gng, gnb, wo, ln2g, ln2b, w1, b1, w2, b2,
                    o_ref):
    x = x_ref[0]                                       # (S, D) f32
    S = x.shape[0]

    # --- pre-LN + head-batched QKV projection (bf16 MXU, f32 accumulation) ---
    h = _layernorm(x, ln1g[...], ln1b[...])
    hb = jnp.broadcast_to(h.astype(jnp.bfloat16), (H,) + h.shape)   # (H, S, D)
    Q = jnp.einsum('hsd,hde->hse', hb, wq[...],
                   preferred_element_type=jnp.float32)              # (H, S, DH)
    K = jnp.einsum('hsd,hde->hse', hb, wk[...],
                   preferred_element_type=jnp.float32)
    V = jnp.einsum('hsd,hde->hse', hb, wv[...],
                   preferred_element_type=jnp.float32)

    # --- XPos rotation (pure VPU) -------------------------------------------
    # wq/wk were column-permuted on the host so each head's output is laid out
    # [even pair elements | odd pair elements]; the interleaved rotary combine
    # then becomes a half-split: no pair-swap matmul, no extra (D,D) weight.
    c = cose[...]                                       # (S, DH//2)
    s = sine[...]
    half = DH // 2

    def _rotate(t):
        te = t[..., :half]                              # (H, S, DH//2)
        to = t[..., half:]
        return jnp.concatenate([te * c - to * s, te * s + to * c], axis=-1)

    Qr = _rotate(Q)
    Kr = _rotate(K)

    # --- retention decay mask, generated in-kernel (EUP), no HBM traffic -----
    hh = lax.broadcasted_iota(jnp.int32, (H, S, S), 0).astype(jnp.float32)
    ii = lax.broadcasted_iota(jnp.int32, (H, S, S), 1).astype(jnp.float32)
    jj = lax.broadcasted_iota(jnp.int32, (H, S, S), 2).astype(jnp.float32)
    scale = 1.0 - jnp.exp(-(5.0 + hh) * _LN2)           # 1 - 2^-(5+h)
    logscale = jnp.log(scale)
    diff = ii - jj
    dmask = jnp.where(diff >= 0.0,
                      jnp.exp(jnp.maximum(diff, 0.0) * logscale),
                      0.0)                              # scale_h^(i-j), causal

    # --- head-batched retention ---------------------------------------------
    # TODO(synk): for long sequences, tile this over query blocks (grid axis
    # over S with a causal skip) instead of a dense (S, S) score tile.
    qk = jnp.einsum('hse,hze->hsz', Qr.astype(jnp.bfloat16),
                    Kr.astype(jnp.bfloat16),
                    preferred_element_type=jnp.float32)             # (H, S, S)
    qkd = qk * dmask
    R = jnp.einsum('hsz,hze->hse', qkd.astype(jnp.bfloat16),
                   V.astype(jnp.bfloat16),
                   preferred_element_type=jnp.float32)              # (H, S, DH)

    # --- per-head GroupNorm (stats in f32) + per-channel affine --------------
    mu = jnp.mean(R, axis=-1, keepdims=True)
    var = jnp.mean((R - mu) ** 2, axis=-1, keepdims=True)
    Rn = (R - mu) * lax.rsqrt(var + 1e-5)
    Rn = Rn * gng[...] + gnb[...]                       # (H, 1, DH) affine

    # --- output projection (head-batched, then summed over heads) ------------
    yh = jnp.einsum('hse,hed->hsd', Rn.astype(jnp.bfloat16), wo[...],
                    preferred_element_type=jnp.float32)             # (H, S, D)
    y1 = jnp.sum(yh, axis=0) + x                        # residual

    # --- FFN block ------------------------------------------------------------
    h2 = _layernorm(y1, ln2g[...], ln2b[...])
    ff = jnp.dot(h2.astype(jnp.bfloat16), w1[...],
                 preferred_element_type=jnp.float32) + b1[...]
    ff = _gelu_exact(ff)
    ff = jnp.dot(ff.astype(jnp.bfloat16), w2[...],
                 preferred_element_type=jnp.float32) + b2[...]
    o_ref[0] = ff + y1


def head_kernel(x_ref, lng, lnb, wp, bp, o_ref):
    h = _layernorm(x_ref[0], lng[...], lnb[...])
    logits = jnp.dot(h.astype(jnp.bfloat16), wp[...],
                     preferred_element_type=jnp.float32) + bp[...]
    m = jnp.max(logits, axis=-1, keepdims=True)
    z = logits - m
    lse = jnp.log(jnp.sum(jnp.exp(z), axis=-1, keepdims=True))
    o_ref[0] = z - lse                                  # log_softmax


# ---------------------------------------------------------------------------
# Wrappers calling pallas_call
# ---------------------------------------------------------------------------
def _full_spec(shape):
    n = len(shape)
    return pl.BlockSpec(shape, lambda b, _n=n: (0,) * _n)


def run_retblock(x, lp, consts):
    B, S, D = x.shape
    H = lp["wq"].shape[0]
    DH = D // H
    Hid = lp["w1"].shape[1]
    # Grid over batch, "parallel": on v7x the two TensorCores each take a batch
    # element; on single-TC v5e/v6e the extra grid step is ~0.35us of overhead.
    in_specs = [
        pl.BlockSpec((1, S, D), lambda b: (b, 0, 0)),            # x
        _full_spec((1, D)), _full_spec((1, D)),                  # ln1 gamma/beta
        _full_spec((H, D, DH)), _full_spec((H, D, DH)),          # WQ, WK (de-interleaved)
        _full_spec((H, D, DH)),                                  # WV
        _full_spec((S, DH // 2)), _full_spec((S, DH // 2)),      # cos / sin (per pair)
        _full_spec((H, 1, DH)), _full_spec((H, 1, DH)),          # GroupNorm affine
        _full_spec((H, DH, D)),                                  # WO, rows split per head
        _full_spec((1, D)), _full_spec((1, D)),                  # ln2 gamma/beta
        _full_spec((D, Hid)), _full_spec((1, Hid)),              # W1 / b1
        _full_spec((Hid, D)), _full_spec((1, D)),                # W2 / b2
    ]
    out_spec = pl.BlockSpec((1, S, D), lambda b: (b, 0, 0))
    fn = pl.pallas_call(
        partial(retblock_kernel, H, DH),
        out_shape=jax.ShapeDtypeStruct((B, S, D), jnp.float32),
        grid=(B,),
        in_specs=in_specs,
        out_specs=out_spec,
        input_output_aliases={0: 0},                    # write residual in place
        compiler_params=pltpu.CompilerParams(dimension_semantics=("parallel",)),
    )
    return fn(x, lp["ln1g"], lp["ln1b"], lp["wq"], lp["wk"], lp["wv"],
              consts["cos"], consts["sin"],
              lp["gng"], lp["gnb"], lp["wo"], lp["ln2g"], lp["ln2b"],
              lp["w1"], lp["b1"], lp["w2"], lp["b2"])


def run_head(x, lng, lnb, wp, bp):
    B, S, D = x.shape
    V = wp.shape[1]
    # TODO(synk): for realistic vocab sizes, tile wp over the vocab axis with an
    # online max/logsumexp accumulator instead of staging the full (D, V) block.
    in_specs = [
        pl.BlockSpec((1, S, D), lambda b: (b, 0, 0)),
        _full_spec((1, D)), _full_spec((1, D)),
        _full_spec((D, V)), _full_spec((1, V)),
    ]
    out_spec = pl.BlockSpec((1, S, V), lambda b: (b, 0, 0))
    fn = pl.pallas_call(
        head_kernel,
        out_shape=jax.ShapeDtypeStruct((B, S, V), jnp.float32),
        grid=(B,),
        in_specs=in_specs,
        out_specs=out_spec,
        compiler_params=pltpu.CompilerParams(dimension_semantics=("parallel",)),
    )
    return fn(x, lng, lnb, wp, bp)


# ---------------------------------------------------------------------------
# Model constants / parameters (deterministic, in-script)
# ---------------------------------------------------------------------------
def make_retention_constants(S, DH):
    # XPos angle for pair i: exponent = 2i/DH, angle = 10^(-4*exponent).
    exponent = np.arange(0, DH, 2, dtype=np.float64) / DH        # (DH/2,)
    angle = 10.0 ** (-4.0 * exponent)
    nangle = np.arange(S, dtype=np.float64)[:, None] * angle[None, :]
    return {
        "cos": jnp.asarray(np.cos(nangle), jnp.float32),         # (S, DH/2)
        "sin": jnp.asarray(np.sin(nangle), jnp.float32),
    }


def init_layer_params(key, D, H, Hid):
    DH = D // H
    ks = jax.random.split(key, 6)
    xav_qkv = math.sqrt(2.0 / (H * D + DH * D))
    xav_o = math.sqrt(2.0 / (D + D))

    WQ = jax.random.normal(ks[0], (H, DH, D), jnp.float32) * xav_qkv
    WK = jax.random.normal(ks[1], (H, DH, D), jnp.float32) * xav_qkv
    WV = jax.random.normal(ks[2], (H, DH, D), jnp.float32) * xav_qkv
    WO = jax.random.normal(ks[3], (D, D), jnp.float32) * xav_o
    W1 = jax.random.normal(ks[4], (D, Hid), jnp.float32) * (1.0 / math.sqrt(D))
    W2 = jax.random.normal(ks[5], (Hid, D), jnp.float32) * (1.0 / math.sqrt(Hid))

    # (H, DH, D) -> (H, D, DH) so the kernel's batched einsum 'hsd,hde->hse'
    # matches torch.einsum('bsd,hud->bshu', x, W).
    def per_head(w):
        return jnp.transpose(w, (0, 2, 1))

    # De-interleave Q/K head outputs to [evens | odds]; QK^T is invariant under
    # a common per-head column permutation, and the XPos rotation then becomes
    # a half-split combine inside the kernel (no pair-swap matmul needed).
    perm = np.concatenate([np.arange(0, DH, 2), np.arange(1, DH, 2)])
    wq = per_head(WQ)[:, :, perm]
    wk = per_head(WK)[:, :, perm]
    wv = per_head(WV)                      # V keeps original order (matches WO rows)
    wo = WO.reshape(H, DH, D)              # rows split per head

    return {
        "ln1g": jnp.ones((1, D), jnp.float32), "ln1b": jnp.zeros((1, D), jnp.float32),
        "ln2g": jnp.ones((1, D), jnp.float32), "ln2b": jnp.zeros((1, D), jnp.float32),
        "gng": jnp.ones((H, 1, DH), jnp.float32), "gnb": jnp.zeros((H, 1, DH), jnp.float32),
        "wq": wq.astype(jnp.bfloat16), "wk": wk.astype(jnp.bfloat16),
        "wv": wv.astype(jnp.bfloat16), "wo": wo.astype(jnp.bfloat16),
        "w1": W1.astype(jnp.bfloat16), "b1": jnp.zeros((1, Hid), jnp.float32),
        "w2": W2.astype(jnp.bfloat16), "b2": jnp.zeros((1, D), jnp.float32),
    }


def sinusoidal_encoding(S, D, offset=0, denominator=10000.0):
    idx = np.arange(0, D, 2, dtype=np.float64)
    div_term = denominator ** (idx / D)                 # (D/2,)
    positions = np.arange(offset, offset + S, dtype=np.float64)
    s = np.sin(positions[:, None] / div_term)
    c = np.cos(positions[:, None] / div_term)
    sin_cos = np.stack([s, c], axis=-1).reshape(S, D)   # interleaved
    return jnp.asarray(sin_cos, jnp.float32)


# ---------------------------------------------------------------------------
# Full GPTR forward (jitted so the in-place layer aliasing is intra-computation)
# ---------------------------------------------------------------------------
def _gptr_forward(tokens, params, consts):
    B, S = tokens.shape
    D = params["embed"].shape[1]
    # Embedding (padding_idx=0 row is zero) + sinusoidal positional encoding:
    # plain-JAX glue around the Pallas kernels.
    xe = params["embed"][tokens] + sinusoidal_encoding(S, D)[None, :, :]
    x = xe.astype(jnp.float32)
    for lp in params["layers"]:
        x = run_retblock(x, lp, consts)
    return run_head(x, params["lnfg"], params["lnfb"], params["wp"], params["bp"])


gptr_forward = jax.jit(_gptr_forward)


if __name__ == "__main__":
    NVOCAB = 64
    DEMBED = 32
    NLAYERS = 2
    NHEADS = 4
    NHIDDEN = 4 * DEMBED
    B, S = 2, 8

    root = jax.random.PRNGKey(0)
    k_emb, k_proj, k_tok, *k_layers = jax.random.split(root, 3 + NLAYERS)

    embed = jax.random.normal(k_emb, (NVOCAB, DEMBED), jnp.float32)
    embed = embed.at[0].set(0.0)                        # padding_idx=0

    params = {
        "embed": embed,
        "layers": [init_layer_params(k, DEMBED, NHEADS, NHIDDEN) for k in k_layers],
        "lnfg": jnp.ones((1, DEMBED), jnp.float32),
        "lnfb": jnp.zeros((1, DEMBED), jnp.float32),
        "wp": (jax.random.normal(k_proj, (DEMBED, NVOCAB), jnp.float32)
               * (1.0 / math.sqrt(DEMBED))).astype(jnp.bfloat16),
        "bp": jnp.zeros((1, NVOCAB), jnp.float32),
    }
    consts = make_retention_constants(S, DEMBED // NHEADS)

    tokens = jax.random.randint(k_tok, (B, S), 0, NVOCAB, dtype=jnp.int32)

    out = gptr_forward(tokens, params, consts)
    out = jax.block_until_ready(out)
    assert out.shape == (B, S, NVOCAB)
    assert bool(jnp.all(jnp.isfinite(out)))
    print("KERNEL_OK")
</pallas_src>

<mosaic_0001>
module attributes {stable_mosaic.version = 11 : i64} {
  func.func @head_kernel(%arg0: i32, %arg1: memref<1x8x32xf32, #tpu.memory_space<vmem>>, %arg2: memref<1x32xf32, #tpu.memory_space<vmem>>, %arg3: memref<1x32xf32, #tpu.memory_space<vmem>>, %arg4: memref<32x64xbf16, #tpu.memory_space<vmem>>, %arg5: memref<1x64xf32, #tpu.memory_space<vmem>>, %arg6: memref<1x8x64xf32, #tpu.memory_space<vmem>>) attributes {dimension_semantics = [#tpu.dimension_semantics<parallel>], iteration_bounds = array<i64: 2>, scalar_prefetch = 0 : i64, scratch_operands = 0 : i64, tpu.core_type = #tpu.core_type<tc>, window_params = [{transform_indices = @transform_0, window_bounds = array<i64: 1, 8, 32>}, {pipeline_mode = #tpu.pipeline_mode<synchronous>, transform_indices = @transform_1, window_bounds = array<i64: 1, 32>}, {pipeline_mode = #tpu.pipeline_mode<synchronous>, transform_indices = @transform_2, window_bounds = array<i64: 1, 32>}, {pipeline_mode = #tpu.pipeline_mode<synchronous>, transform_indices = @transform_3, window_bounds = array<i64: 32, 64>}, {pipeline_mode = #tpu.pipeline_mode<synchronous>, transform_indices = @transform_4, window_bounds = array<i64: 1, 64>}, {transform_indices = @transform_5, window_bounds = array<i64: 1, 8, 64>}]} {
    %c0 = arith.constant 0 : index
    %c0_0 = arith.constant 0 : index
    %c0_1 = arith.constant 0 : index
    %0 = vector.load %arg1[%c0, %c0_0, %c0_1] : memref<1x8x32xf32, #tpu.memory_space<vmem>>, vector<1x8x32xf32>
    %1 = vector.shape_cast %0 : vector<1x8x32xf32> to vector<8x32xf32>
    %c0_2 = arith.constant 0 : index
    %c0_3 = arith.constant 0 : index
    %2 = vector.load %arg2[%c0_2, %c0_3] : memref<1x32xf32, #tpu.memory_space<vmem>>, vector<1x32xf32>
    %c0_4 = arith.constant 0 : index
    %c0_5 = arith.constant 0 : index
    %3 = vector.load %arg3[%c0_4, %c0_5] : memref<1x32xf32, #tpu.memory_space<vmem>>, vector<1x32xf32>
    %cst = arith.constant dense<0.000000e+00> : vector<8xf32>
    %4 = vector.multi_reduction <add>, %1, %cst [1] : vector<8x32xf32> to vector<8xf32>
    %5 = vector.shape_cast %4 : vector<8xf32> to vector<8x1xf32>
    %cst_6 = arith.constant 3.200000e+01 : f32
    %6 = vector.broadcast %cst_6 : f32 to vector<8x1xf32>
    %7 = arith.divf %5, %6 : vector<8x1xf32>
    %8 = vector.broadcast %7 : vector<8x1xf32> to vector<8x32xf32>
    %9 = arith.subf %1, %8 : vector<8x32xf32>
    %10 = arith.mulf %9, %9 : vector<8x32xf32>
    %cst_7 = arith.constant dense<0.000000e+00> : vector<8xf32>
    %11 = vector.multi_reduction <add>, %10, %cst_7 [1] : vector<8x32xf32> to vector<8xf32>
    %12 = vector.shape_cast %11 : vector<8xf32> to vector<8x1xf32>
    %cst_8 = arith.constant 3.200000e+01 : f32
    %13 = vector.broadcast %cst_8 : f32 to vector<8x1xf32>
    %14 = arith.divf %12, %13 : vector<8x1xf32>
    %15 = vector.broadcast %7 : vector<8x1xf32> to vector<8x32xf32>
    %16 = arith.subf %1, %15 : vector<8x32xf32>
    %cst_9 = arith.constant 9.99999974E-6 : f32
    %17 = vector.broadcast %cst_9 : f32 to vector<8x1xf32>
    %18 = arith.addf %14, %17 : vector<8x1xf32>
    %19 = math.rsqrt %18 : vector<8x1xf32>
    %20 = vector.broadcast %19 : vector<8x1xf32> to vector<8x32xf32>
    %21 = arith.mulf %16, %20 : vector<8x32xf32>
    %22 = vector.broadcast %2 : vector<1x32xf32> to vector<8x32xf32>
    %23 = arith.mulf %21, %22 : vector<8x32xf32>
    %24 = vector.broadcast %3 : vector<1x32xf32> to vector<8x32xf32>
    %25 = arith.addf %23, %24 : vector<8x32xf32>
    %26 = arith.truncf %25 : vector<8x32xf32> to vector<8x32xbf16>
    %c0_10 = arith.constant 0 : index
    %c0_11 = arith.constant 0 : index
    %27 = vector.load %arg4[%c0_10, %c0_11] : memref<32x64xbf16, #tpu.memory_space<vmem>>, vector<32x64xbf16>
    %cst_12 = arith.constant dense<0.000000e+00> : vector<8x64xf32>
    %28 = tpu.matmul %26, %27, %cst_12 {dimension_numbers = #tpu.dot_dimension_numbers<[1], [0], [0], [1], [0, 0, 1, 1], [], []>} : vector<8x32xbf16>, vector<32x64xbf16>, vector<8x64xf32> -> vector<8x64xf32>
    %c0_13 = arith.constant 0 : index
    %c0_14 = arith.constant 0 : index
    %29 = vector.load %arg5[%c0_13, %c0_14] : memref<1x64xf32, #tpu.memory_space<vmem>>, vector<1x64xf32>
    %30 = vector.broadcast %29 : vector<1x64xf32> to vector<8x64xf32>
    %31 = arith.addf %28, %30 : vector<8x64xf32>
    %cst_15 = arith.constant dense<0xFF800000> : vector<8xf32>
    %32 = vector.multi_reduction <maximumf>, %31, %cst_15 [1] : vector<8x64xf32> to vector<8xf32>
    %33 = vector.shape_cast %32 : vector<8xf32> to vector<8x1xf32>
    %34 = vector.broadcast %33 : vector<8x1xf32> to vector<8x64xf32>
    %35 = arith.subf %31, %34 : vector<8x64xf32>
    %36 = math.exp %35 : vector<8x64xf32>
    %cst_16 = arith.constant dense<0.000000e+00> : vector<8xf32>
    %37 = vector.multi_reduction <add>, %36, %cst_16 [1] : vector<8x64xf32> to vector<8xf32>
    %38 = vector.shape_cast %37 : vector<8xf32> to vector<8x1xf32>
    %39 = math.log %38 : vector<8x1xf32>
    %40 = vector.broadcast %39 : vector<8x1xf32> to vector<8x64xf32>
    %41 = arith.subf %35, %40 : vector<8x64xf32>
    %c0_17 = arith.constant 0 : index
    %c0_18 = arith.constant 0 : index
    %c0_19 = arith.constant 0 : index
    %42 = vector.load %arg6[%c0_17, %c0_18, %c0_19] : memref<1x8x64xf32, #tpu.memory_space<vmem>>, vector<1x8x64xf32>
    %43 = vector.shape_cast %42 : vector<1x8x64xf32> to vector<8x64xf32>
    %44 = vector.shape_cast %41 : vector<8x64xf32> to vector<1x8x64xf32>
    tpu.vector_store %arg6[%c0_17, %c0_18, %c0_19], %44 {strides = array<i32>} : memref<1x8x64xf32, #tpu.memory_space<vmem>>, vector<1x8x64xf32>,
    return
  }
  func.func @transform_0(%arg0: i32) -> (i32, i32, i32) {
    %c0_i32 = arith.constant 0 : i32
    %c0_i32_0 = arith.constant 0 : i32
    %c0_i32_1 = arith.constant 0 : i32
    return %arg0, %c0_i32, %c0_i32_0 : i32, i32, i32
  }
  func.func @transform_1(%arg0: i32) -> (i32, i32) {
    %c0_i32 = arith.constant 0 : i32
    %c0_i32_0 = arith.constant 0 : i32
    %c0_i32_1 = arith.constant 0 : i32
    return %c0_i32, %c0_i32_0 : i32, i32
  }
  func.func @transform_2(%arg0: i32) -> (i32, i32) {
    %c0_i32 = arith.constant 0 : i32
    %c0_i32_0 = arith.constant 0 : i32
    %c0_i32_1 = arith.constant 0 : i32
    return %c0_i32, %c0_i32_0 : i32, i32
  }
  func.func @transform_3(%arg0: i32) -> (i32, i32) {
    %c0_i32 = arith.constant 0 : i32
    %c0_i32_0 = arith.constant 0 : i32
    %c0_i32_1 = arith.constant 0 : i32
    return %c0_i32, %c0_i32_0 : i32, i32
  }
  func.func @transform_4(%arg0: i32) -> (i32, i32) {
    %c0_i32 = arith.constant 0 : i32
    %c0_i32_0 = arith.constant 0 : i32
    %c0_i32_1 = arith.constant 0 : i32
    return %c0_i32, %c0_i32_0 : i32, i32
  }
  func.func @transform_5(%arg0: i32) -> (i32, i32, i32) {
    %c0_i32 = arith.constant 0 : i32
    %c0_i32_0 = arith.constant 0 : i32
    %c0_i32_1 = arith.constant 0 : i32
    return %arg0, %c0_i32, %c0_i32_0 : i32, i32, i32
  }
}

module attributes {stable_mosaic.version = 11 : i64} {
  func.func @retblock_kernel(%arg0: i32, %arg1: memref<1x8x32xf32, #tpu.memory_space<vmem>>, %arg2: memref<1x32xf32, #tpu.memory_space<vmem>>, %arg3: memref<1x32xf32, #tpu.memory_space<vmem>>, %arg4: memref<4x32x8xbf16, #tpu.memory_space<vmem>>, %arg5: memref<4x32x8xbf16, #tpu.memory_space<vmem>>, %arg6: memref<4x32x8xbf16, #tpu.memory_space<vmem>>, %arg7: memref<8x4xf32, #tpu.memory_space<vmem>>, %arg8: memref<8x4xf32, #tpu.memory_space<vmem>>, %arg9: memref<4x1x8xf32, #tpu.memory_space<vmem>>, %arg10: memref<4x1x8xf32, #tpu.memory_space<vmem>>, %arg11: memref<4x8x32xbf16, #tpu.memory_space<vmem>>, %arg12: memref<1x32xf32, #tpu.memory_space<vmem>>, %arg13: memref<1x32xf32, #tpu.memory_space<vmem>>, %arg14: memref<32x128xbf16, #tpu.memory_space<vmem>>, %arg15: memref<1x128xf32, #tpu.memory_space<vmem>>, %arg16: memref<128x32xbf16, #tpu.memory_space<vmem>>, %arg17: memref<1x32xf32, #tpu.memory_space<vmem>>, %arg18: memref<1x8x32xf32, #tpu.memory_space<vmem>>) attributes {dimension_semantics = [#tpu.dimension_semantics<parallel>], iteration_bounds = array<i64: 2>, scalar_prefetch = 0 : i64, scratch_operands = 0 : i64, tpu.core_type = #tpu.core_type<tc>, window_params = [{transform_indices = @transform_0, window_bounds = array<i64: 1, 8, 32>}, {pipeline_mode = #tpu.pipeline_mode<synchronous>, transform_indices = @transform_1, window_bounds = array<i64: 1, 32>}, {pipeline_mode = #tpu.pipeline_mode<synchronous>, transform_indices = @transform_2, window_bounds = array<i64: 1, 32>}, {pipeline_mode = #tpu.pipeline_mode<synchronous>, transform_indices = @transform_3, window_bounds = array<i64: 4, 32, 8>}, {pipeline_mode = #tpu.pipeline_mode<synchronous>, transform_indices = @transform_4, window_bounds = array<i64: 4, 32, 8>}, {pipeline_mode = #tpu.pipeline_mode<synchronous>, transform_indices = @transform_5, window_bounds = array<i64: 4, 32, 8>}, {pipeline_mode = #tpu.pipeline_mode<synchronous>, transform_indices = @transform_6, window_bounds = array<i64: 8, 4>}, {pipeline_mode = #tpu.pipeline_mode<synchronous>, transform_indices = @transform_7, window_bounds = array<i64: 8, 4>}, {pipeline_mode = #tpu.pipeline_mode<synchronous>, transform_indices = @transform_8, window_bounds = array<i64: 4, 1, 8>}, {pipeline_mode = #tpu.pipeline_mode<synchronous>, transform_indices = @transform_9, window_bounds = array<i64: 4, 1, 8>}, {pipeline_mode = #tpu.pipeline_mode<synchronous>, transform_indices = @transform_10, window_bounds = array<i64: 4, 8, 32>}, {pipeline_mode = #tpu.pipeline_mode<synchronous>, transform_indices = @transform_11, window_bounds = array<i64: 1, 32>}, {pipeline_mode = #tpu.pipeline_mode<synchronous>, transform_indices = @transform_12, window_bounds = array<i64: 1, 32>}, {pipeline_mode = #tpu.pipeline_mode<synchronous>, transform_indices = @transform_13, window_bounds = array<i64: 32, 128>}, {pipeline_mode = #tpu.pipeline_mode<synchronous>, transform_indices = @transform_14, window_bounds = array<i64: 1, 128>}, {pipeline_mode = #tpu.pipeline_mode<synchronous>, transform_indices = @transform_15, window_bounds = array<i64: 128, 32>}, {pipeline_mode = #tpu.pipeline_mode<synchronous>, transform_indices = @transform_16, window_bounds = array<i64: 1, 32>}, {transform_indices = @transform_17, window_bounds = array<i64: 1, 8, 32>}]} {
    %c0 = arith.constant 0 : index
    %c0_0 = arith.constant 0 : index
    %c0_1 = arith.constant 0 : index
    %0 = vector.load %arg1[%c0, %c0_0, %c0_1] : memref<1x8x32xf32, #tpu.memory_space<vmem>>, vector<1x8x32xf32>
    %1 = vector.shape_cast %0 : vector<1x8x32xf32> to vector<8x32xf32>
    %c0_2 = arith.constant 0 : index
    %c0_3 = arith.constant 0 : index
    %2 = vector.load %arg2[%c0_2, %c0_3] : memref<1x32xf32, #tpu.memory_space<vmem>>, vector<1x32xf32>
    %c0_4 = arith.constant 0 : index
    %c0_5 = arith.constant 0 : index
    %3 = vector.load %arg3[%c0_4, %c0_5] : memref<1x32xf32, #tpu.memory_space<vmem>>, vector<1x32xf32>
    %cst = arith.constant dense<0.000000e+00> : vector<8xf32>
    %4 = vector.multi_reduction <add>, %1, %cst [1] : vector<8x32xf32> to vector<8xf32>
    %5 = vector.shape_cast %4 : vector<8xf32> to vector<8x1xf32>
    %cst_6 = arith.constant 3.200000e+01 : f32
    %6 = vector.broadcast %cst_6 : f32 to vector<8x1xf32>
    %7 = arith.divf %5, %6 : vector<8x1xf32>
    %8 = vector.broadcast %7 : vector<8x1xf32> to vector<8x32xf32>
    %9 = arith.subf %1, %8 : vector<8x32xf32>
    %10 = arith.mulf %9, %9 : vector<8x32xf32>
    %cst_7 = arith.constant dense<0.000000e+00> : vector<8xf32>
    %11 = vector.multi_reduction <add>, %10, %cst_7 [1] : vector<8x32xf32> to vector<8xf32>
    %12 = vector.shape_cast %11 : vector<8xf32> to vector<8x1xf32>
    %cst_8 = arith.constant 3.200000e+01 : f32
    %13 = vector.broadcast %cst_8 : f32 to vector<8x1xf32>
    %14 = arith.divf %12, %13 : vector<8x1xf32>
    %15 = vector.broadcast %7 : vector<8x1xf32> to vector<8x32xf32>
    %16 = arith.subf %1, %15 : vector<8x32xf32>
    %cst_9 = arith.constant 9.99999974E-6 : f32
    %17 = vector.broadcast %cst_9 : f32 to vector<8x1xf32>
    %18 = arith.addf %14, %17 : vector<8x1xf32>
    %19 = math.rsqrt %18 : vector<8x1xf32>
    %20 = vector.broadcast %19 : vector<8x1xf32> to vector<8x32xf32>
    %21 = arith.mulf %16, %20 : vector<8x32xf32>
    %22 = vector.broadcast %2 : vector<1x32xf32> to vector<8x32xf32>
    %23 = arith.mulf %21, %22 : vector<8x32xf32>
    %24 = vector.broadcast %3 : vector<1x32xf32> to vector<8x32xf32>
    %25 = arith.addf %23, %24 : vector<8x32xf32>
    %26 = arith.truncf %25 : vector<8x32xf32> to vector<8x32xbf16>
    %27 = vector.shape_cast %26 : vector<8x32xbf16> to vector<1x8x32xbf16>
    %28 = vector.broadcast %27 : vector<1x8x32xbf16> to vector<4x8x32xbf16>
    %c0_10 = arith.constant 0 : index
    %c0_11 = arith.constant 0 : index
    %c0_12 = arith.constant 0 : index
    %29 = vector.load %arg4[%c0_10, %c0_11, %c0_12] : memref<4x32x8xbf16, #tpu.memory_space<vmem>>, vector<4x32x8xbf16>
    "tpu.trace_start"() <{level = 10 : i32, message = "hsd,hde->hse"}> : () -> ()
    %cst_13 = arith.constant dense<0.000000e+00> : vector<4x8x8xf32>
    %30 = tpu.matmul %28, %29, %cst_13 {dimension_numbers = #tpu.dot_dimension_numbers<[2], [1], [1], [2], [0, 0, 0, 1, 1, 2], [0], [0]>} : vector<4x8x32xbf16>, vector<4x32x8xbf16>, vector<4x8x8xf32> -> vector<4x8x8xf32>
    "tpu.trace_stop"() : () -> ()
    %c0_14 = arith.constant 0 : index
    %c0_15 = arith.constant 0 : index
    %c0_16 = arith.constant 0 : index
    %31 = vector.load %arg5[%c0_14, %c0_15, %c0_16] : memref<4x32x8xbf16, #tpu.memory_space<vmem>>, vector<4x32x8xbf16>
    "tpu.trace_start"() <{level = 10 : i32, message = "hsd,hde->hse"}> : () -> ()
    %cst_17 = arith.constant dense<0.000000e+00> : vector<4x8x8xf32>
    %32 = tpu.matmul %28, %31, %cst_17 {dimension_numbers = #tpu.dot_dimension_numbers<[2], [1], [1], [2], [0, 0, 0, 1, 1, 2], [0], [0]>} : vector<4x8x32xbf16>, vector<4x32x8xbf16>, vector<4x8x8xf32> -> vector<4x8x8xf32>
    "tpu.trace_stop"() : () -> ()
    %c0_18 = arith.constant 0 : index
    %c0_19 = arith.constant 0 : index
    %c0_20 = arith.constant 0 : index
    %33 = vector.load %arg6[%c0_18, %c0_19, %c0_20] : memref<4x32x8xbf16, #tpu.memory_space<vmem>>, vector<4x32x8xbf16>
    "tpu.trace_start"() <{level = 10 : i32, message = "hsd,hde->hse"}> : () -> ()
    %cst_21 = arith.constant dense<0.000000e+00> : vector<4x8x8xf32>
    %34 = tpu.matmul %28, %33, %cst_21 {dimension_numbers = #tpu.dot_dimension_numbers<[2], [1], [1], [2], [0, 0, 0, 1, 1, 2], [0], [0]>} : vector<4x8x32xbf16>, vector<4x32x8xbf16>, vector<4x8x8xf32> -> vector<4x8x8xf32>
    "tpu.trace_stop"() : () -> ()
    %c0_22 = arith.constant 0 : index
    %c0_23 = arith.constant 0 : index
    %35 = vector.load %arg7[%c0_22, %c0_23] : memref<8x4xf32, #tpu.memory_space<vmem>>, vector<8x4xf32>
    %c0_24 = arith.constant 0 : index
    %c0_25 = arith.constant 0 : index
    %36 = vector.load %arg8[%c0_24, %c0_25] : memref<8x4xf32, #tpu.memory_space<vmem>>, vector<8x4xf32>
    %37 = vector.extract_strided_slice %30 {offsets = [0, 0, 0], sizes = [4, 8, 4], strides = [1, 1, 1]} : vector<4x8x8xf32> to vector<4x8x4xf32>
    %38 = vector.extract_strided_slice %30 {offsets = [0, 0, 4], sizes = [4, 8, 4], strides = [1, 1, 1]} : vector<4x8x8xf32> to vector<4x8x4xf32>
    %39 = vector.shape_cast %35 : vector<8x4xf32> to vector<1x8x4xf32>
    %40 = vector.broadcast %39 : vector<1x8x4xf32> to vector<4x8x4xf32>
    %41 = arith.mulf %37, %40 : vector<4x8x4xf32>
    %42 = vector.shape_cast %36 : vector<8x4xf32> to vector<1x8x4xf32>
    %43 = vector.broadcast %42 : vector<1x8x4xf32> to vector<4x8x4xf32>
    %44 = arith.mulf %38, %43 : vector<4x8x4xf32>
    %45 = arith.subf %41, %44 : vector<4x8x4xf32>
    %46 = vector.shape_cast %36 : vector<8x4xf32> to vector<1x8x4xf32>
    %47 = vector.broadcast %46 : vector<1x8x4xf32> to vector<4x8x4xf32>
    %48 = arith.mulf %37, %47 : vector<4x8x4xf32>
    %49 = vector.shape_cast %35 : vector<8x4xf32> to vector<1x8x4xf32>
    %50 = vector.broadcast %49 : vector<1x8x4xf32> to vector<4x8x4xf32>
    %51 = arith.mulf %38, %50 : vector<4x8x4xf32>
    %52 = arith.addf %48, %51 : vector<4x8x4xf32>
    %53 = tpu.concatenate %45, %52 in 2 : vector<4x8x4xf32>, vector<4x8x4xf32> -> vector<4x8x8xf32>
    %54 = vector.extract_strided_slice %32 {offsets = [0, 0, 0], sizes = [4, 8, 4], strides = [1, 1, 1]} : vector<4x8x8xf32> to vector<4x8x4xf32>
    %55 = vector.extract_strided_slice %32 {offsets = [0, 0, 4], sizes = [4, 8, 4], strides = [1, 1, 1]} : vector<4x8x8xf32> to vector<4x8x4xf32>
    %56 = vector.shape_cast %35 : vector<8x4xf32> to vector<1x8x4xf32>
    %57 = vector.broadcast %56 : vector<1x8x4xf32> to vector<4x8x4xf32>
    %58 = arith.mulf %54, %57 : vector<4x8x4xf32>
    %59 = vector.shape_cast %36 : vector<8x4xf32> to vector<1x8x4xf32>
    %60 = vector.broadcast %59 : vector<1x8x4xf32> to vector<4x8x4xf32>
    %61 = arith.mulf %55, %60 : vector<4x8x4xf32>
    %62 = arith.subf %58, %61 : vector<4x8x4xf32>
    %63 = vector.shape_cast %36 : vector<8x4xf32> to vector<1x8x4xf32>
    %64 = vector.broadcast %63 : vector<1x8x4xf32> to vector<4x8x4xf32>
    %65 = arith.mulf %54, %64 : vector<4x8x4xf32>
    %66 = vector.shape_cast %35 : vector<8x4xf32> to vector<1x8x4xf32>
    %67 = vector.broadcast %66 : vector<1x8x4xf32> to vector<4x8x4xf32>
    %68 = arith.mulf %55, %67 : vector<4x8x4xf32>
    %69 = arith.addf %65, %68 : vector<4x8x4xf32>
    %70 = tpu.concatenate %62, %69 in 2 : vector<4x8x4xf32>, vector<4x8x4xf32> -> vector<4x8x8xf32>
    %71 = tpu.iota {dimensions = array<i32: 0>} : vector<4x8x8xi32>
    %72 = arith.sitofp %71 : vector<4x8x8xi32> to vector<4x8x8xf32>
    %73 = tpu.iota {dimensions = array<i32: 1>} : vector<4x8x8xi32>
    %74 = arith.sitofp %73 : vector<4x8x8xi32> to vector<4x8x8xf32>
    %75 = tpu.iota {dimensions = array<i32: 2>} : vector<4x8x8xi32>
    %76 = arith.sitofp %75 : vector<4x8x8xi32> to vector<4x8x8xf32>
    %cst_26 = arith.constant 5.000000e+00 : f32
    %77 = vector.broadcast %cst_26 : f32 to vector<4x8x8xf32>
    %78 = arith.addf %77, %72 : vector<4x8x8xf32>
    %cst_27 = arith.constant 0.000000e+00 : f32
    %79 = vector.broadcast %cst_27 : f32 to vector<4x8x8xf32>
    %80 = arith.subf %79, %78 : vector<4x8x8xf32>
    %cst_28 = arith.constant 0.693147182 : f32
    %81 = vector.broadcast %cst_28 : f32 to vector<4x8x8xf32>
    %82 = arith.mulf %80, %81 : vector<4x8x8xf32>
    %83 = math.exp %82 : vector<4x8x8xf32>
    %cst_29 = arith.constant 1.000000e+00 : f32
    %84 = vector.broadcast %cst_29 : f32 to vector<4x8x8xf32>
    %85 = arith.subf %84, %83 : vector<4x8x8xf32>
    %86 = math.log %85 : vector<4x8x8xf32>
    %87 = arith.subf %74, %76 : vector<4x8x8xf32>
    %cst_30 = arith.constant 0.000000e+00 : f32
    %88 = vector.broadcast %cst_30 : f32 to vector<4x8x8xf32>
    %89 = arith.cmpf oge, %87, %88 : vector<4x8x8xf32>
    %cst_31 = arith.constant 0.000000e+00 : f32
    %90 = vector.broadcast %cst_31 : f32 to vector<4x8x8xf32>
    %91 = arith.maximumf %87, %90 : vector<4x8x8xf32>
    %92 = arith.mulf %91, %86 : vector<4x8x8xf32>
    %93 = math.exp %92 : vector<4x8x8xf32>
    %cst_32 = arith.constant 0.000000e+00 : f32
    %94 = vector.broadcast %cst_32 : f32 to vector<4x8x8xf32>
    %95 = arith.select %89, %93, %94 : vector<4x8x8xi1>, vector<4x8x8xf32>
    %96 = arith.truncf %53 : vector<4x8x8xf32> to vector<4x8x8xbf16>
    %97 = arith.truncf %70 : vector<4x8x8xf32> to vector<4x8x8xbf16>
    "tpu.trace_start"() <{level = 10 : i32, message = "hse,hze->hsz"}> : () -> ()
    %cst_33 = arith.constant dense<0.000000e+00> : vector<4x8x8xf32>
    %98 = tpu.matmul %96, %97, %cst_33 {dimension_numbers = #tpu.dot_dimension_numbers<[2], [2], [1], [1], [0, 0, 0, 1, 1, 1], [0], [0]>} : vector<4x8x8xbf16>, vector<4x8x8xbf16>, vector<4x8x8xf32> -> vector<4x8x8xf32>
    "tpu.trace_stop"() : () -> ()
    %99 = arith.mulf %98, %95 : vector<4x8x8xf32>
    %100 = arith.truncf %99 : vector<4x8x8xf32> to vector<4x8x8xbf16>
    %101 = arith.truncf %34 : vector<4x8x8xf32> to vector<4x8x8xbf16>
    "tpu.trace_start"() <{level = 10 : i32, message = "hsz,hze->hse"}> : () -> ()
    %cst_34 = arith.constant dense<0.000000e+00> : vector<4x8x8xf32>
    %102 = tpu.matmul %100, %101, %cst_34 {dimension_numbers = #tpu.dot_dimension_numbers<[2], [1], [1], [2], [0, 0, 0, 1, 1, 2], [0], [0]>} : vector<4x8x8xbf16>, vector<4x8x8xbf16>, vector<4x8x8xf32> -> vector<4x8x8xf32>
    "tpu.trace_stop"() : () -> ()
    %cst_35 = arith.constant dense<0.000000e+00> : vector<4x8xf32>
    %103 = vector.multi_reduction <add>, %102, %cst_35 [2] : vector<4x8x8xf32> to vector<4x8xf32>
    %104 = vector.shape_cast %103 : vector<4x8xf32> to vector<4x8x1xf32>
    %cst_36 = arith.constant 8.000000e+00 : f32
    %105 = vector.broadcast %cst_36 : f32 to vector<4x8x1xf32>
    %106 = arith.divf %104, %105 : vector<4x8x1xf32>
    %107 = vector.broadcast %106 : vector<4x8x1xf32> to vector<4x8x8xf32>
    %108 = arith.subf %102, %107 : vector<4x8x8xf32>
    %109 = arith.mulf %108, %108 : vector<4x8x8xf32>
    %cst_37 = arith.constant dense<0.000000e+00> : vector<4x8xf32>
    %110 = vector.multi_reduction <add>, %109, %cst_37 [2] : vector<4x8x8xf32> to vector<4x8xf32>
    %111 = vector.shape_cast %110 : vector<4x8xf32> to vector<4x8x1xf32>
    %cst_38 = arith.constant 8.000000e+00 : f32
    %112 = vector.broadcast %cst_38 : f32 to vector<4x8x1xf32>
    %113 = arith.divf %111, %112 : vector<4x8x1xf32>
    %114 = vector.broadcast %106 : vector<4x8x1xf32> to vector<4x8x8xf32>
    %115 = arith.subf %102, %114 : vector<4x8x8xf32>
    %cst_39 = arith.constant 9.99999974E-6 : f32
    %116 = vector.broadcast %cst_39 : f32 to vector<4x8x1xf32>
    %117 = arith.addf %113, %116 : vector<4x8x1xf32>
    %118 = math.rsqrt %117 : vector<4x8x1xf32>
    %119 = vector.broadcast %118 : vector<4x8x1xf32> to vector<4x8x8xf32>
    %120 = arith.mulf %115, %119 : vector<4x8x8xf32>
    %c0_40 = arith.constant 0 : index
    %c0_41 = arith.constant 0 : index
    %c0_42 = arith.constant 0 : index
    %121 = vector.load %arg9[%c0_40, %c0_41, %c0_42] : memref<4x1x8xf32, #tpu.memory_space<vmem>>, vector<4x1x8xf32>
    %122 = vector.broadcast %121 : vector<4x1x8xf32> to vector<4x8x8xf32>
    %123 = arith.mulf %120, %122 : vector<4x8x8xf32>
    %c0_43 = arith.constant 0 : index
    %c0_44 = arith.constant 0 : index
    %c0_45 = arith.constant 0 : index
    %124 = vector.load %arg10[%c0_43, %c0_44, %c0_45] : memref<4x1x8xf32, #tpu.memory_space<vmem>>, vector<4x1x8xf32>
    %125 = vector.broadcast %124 : vector<4x1x8xf32> to vector<4x8x8xf32>
    %126 = arith.addf %123, %125 : vector<4x8x8xf32>
    %127 = arith.truncf %126 : vector<4x8x8xf32> to vector<4x8x8xbf16>
    %c0_46 = arith.constant 0 : index
    %c0_47 = arith.constant 0 : index
    %c0_48 = arith.constant 0 : index
    %128 = vector.load %arg11[%c0_46, %c0_47, %c0_48] : memref<4x8x32xbf16, #tpu.memory_space<vmem>>, vector<4x8x32xbf16>
    "tpu.trace_start"() <{level = 10 : i32, message = "hse,hed->hsd"}> : () -> ()
    %cst_49 = arith.constant dense<0.000000e+00> : vector<4x8x32xf32>
    %129 = tpu.matmul %127, %128, %cst_49 {dimension_numbers = #tpu.dot_dimension_numbers<[2], [1], [1], [2], [0, 0, 0, 1, 1, 2], [0], [0]>} : vector<4x8x8xbf16>, vector<4x8x32xbf16>, vector<4x8x32xf32> -> vector<4x8x32xf32>
    "tpu.trace_stop"() : () -> ()
    %cst_50 = arith.constant dense<0.000000e+00> : vector<8x32xf32>
    %130 = vector.multi_reduction <add>, %129, %cst_50 [0] : vector<4x8x32xf32> to vector<8x32xf32>
    %131 = arith.addf %130, %1 : vector<8x32xf32>
    %c0_51 = arith.constant 0 : index
    %c0_52 = arith.constant 0 : index
    %132 = vector.load %arg12[%c0_51, %c0_52] : memref<1x32xf32, #tpu.memory_space<vmem>>, vector<1x32xf32>
    %c0_53 = arith.constant 0 : index
    %c0_54 = arith.constant 0 : index
    %133 = vector.load %arg13[%c0_53, %c0_54] : memref<1x32xf32, #tpu.memory_space<vmem>>, vector<1x32xf32>
    %cst_55 = arith.constant dense<0.000000e+00> : vector<8xf32>
    %134 = vector.multi_reduction <add>, %131, %cst_55 [1] : vector<8x32xf32> to vector<8xf32>
    %135 = vector.shape_cast %134 : vector<8xf32> to vector<8x1xf32>
    %cst_56 = arith.constant 3.200000e+01 : f32
    %136 = vector.broadcast %cst_56 : f32 to vector<8x1xf32>
    %137 = arith.divf %135, %136 : vector<8x1xf32>
    %138 = vector.broadcast %137 : vector<8x1xf32> to vector<8x32xf32>
    %139 = arith.subf %131, %138 : vector<8x32xf32>
    %140 = arith.mulf %139, %139 : vector<8x32xf32>
    %cst_57 = arith.constant dense<0.000000e+00> : vector<8xf32>
    %141 = vector.multi_reduction <add>, %140, %cst_57 [1] : vector<8x32xf32> to vector<8xf32>
    %142 = vector.shape_cast %141 : vector<8xf32> to vector<8x1xf32>
    %cst_58 = arith.constant 3.200000e+01 : f32
    %143 = vector.broadcast %cst_58 : f32 to vector<8x1xf32>
    %144 = arith.divf %142, %143 : vector<8x1xf32>
    %145 = vector.broadcast %137 : vector<8x1xf32> to vector<8x32xf32>
    %146 = arith.subf %131, %145 : vector<8x32xf32>
    %cst_59 = arith.constant 9.99999974E-6 : f32
    %147 = vector.broadcast %cst_59 : f32 to vector<8x1xf32>
    %148 = arith.addf %144, %147 : vector<8x1xf32>
    %149 = math.rsqrt %148 : vector<8x1xf32>
    %150 = vector.broadcast %149 : vector<8x1xf32> to vector<8x32xf32>
    %151 = arith.mulf %146, %150 : vector<8x32xf32>
    %152 = vector.broadcast %132 : vector<1x32xf32> to vector<8x32xf32>
    %153 = arith.mulf %151, %152 : vector<8x32xf32>
    %154 = vector.broadcast %133 : vector<1x32xf32> to vector<8x32xf32>
    %155 = arith.addf %153, %154 : vector<8x32xf32>
    %156 = arith.truncf %155 : vector<8x32xf32> to vector<8x32xbf16>
    %c0_60 = arith.constant 0 : index
    %c0_61 = arith.constant 0 : index
    %157 = vector.load %arg14[%c0_60, %c0_61] : memref<32x128xbf16, #tpu.memory_space<vmem>>, vector<32x128xbf16>
    %cst_62 = arith.constant dense<0.000000e+00> : vector<8x128xf32>
    %158 = tpu.matmul %156, %157, %cst_62 {dimension_numbers = #tpu.dot_dimension_numbers<[1], [0], [0], [1], [0, 0, 1, 1], [], []>} : vector<8x32xbf16>, vector<32x128xbf16>, vector<8x128xf32> -> vector<8x128xf32>
    %c0_63 = arith.constant 0 : index
    %c0_64 = arith.constant 0 : index
    %159 = vector.load %arg15[%c0_63, %c0_64] : memref<1x128xf32, #tpu.memory_space<vmem>>, vector<1x128xf32>
    %160 = vector.broadcast %159 : vector<1x128xf32> to vector<8x128xf32>
    %161 = arith.addf %158, %160 : vector<8x128xf32>
    %cst_65 = arith.constant 5.000000e-01 : f32
    %162 = vector.broadcast %cst_65 : f32 to vector<8x128xf32>
    %163 = arith.mulf %162, %161 : vector<8x128xf32>
    %cst_66 = arith.constant 0.707106769 : f32
    %164 = vector.broadcast %cst_66 : f32 to vector<8x128xf32>
    %165 = arith.mulf %161, %164 : vector<8x128xf32>
    %166 = math.absf %165 : vector<8x128xf32>
    %cst_67 = arith.constant 0.327591091 : f32
    %167 = vector.broadcast %cst_67 : f32 to vector<8x128xf32>
    %168 = arith.mulf %167, %166 : vector<8x128xf32>
    %cst_68 = arith.constant 1.000000e+00 : f32
    %169 = vector.broadcast %cst_68 : f32 to vector<8x128xf32>
    %170 = arith.addf %169, %168 : vector<8x128xf32>
    %cst_69 = arith.constant 1.000000e+00 : f32
    %171 = vector.broadcast %cst_69 : f32 to vector<8x128xf32>
    %172 = arith.divf %171, %170 : vector<8x128xf32>
    %cst_70 = arith.constant 1.06140542 : f32
    %173 = vector.broadcast %cst_70 : f32 to vector<8x128xf32>
    %174 = arith.mulf %173, %172 : vector<8x128xf32>
    %cst_71 = arith.constant -1.45315206 : f32
    %175 = vector.broadcast %cst_71 : f32 to vector<8x128xf32>
    %176 = arith.addf %174, %175 : vector<8x128xf32>
    %177 = arith.mulf %176, %172 : vector<8x128xf32>
    %cst_72 = arith.constant 1.42141378 : f32
    %178 = vector.broadcast %cst_72 : f32 to vector<8x128xf32>
    %179 = arith.addf %177, %178 : vector<8x128xf32>
    %180 = arith.mulf %179, %172 : vector<8x128xf32>
    %cst_73 = arith.constant -0.284496725 : f32
    %181 = vector.broadcast %cst_73 : f32 to vector<8x128xf32>
    %182 = arith.addf %180, %181 : vector<8x128xf32>
    %183 = arith.mulf %182, %172 : vector<8x128xf32>
    %cst_74 = arith.constant 0.254829586 : f32
    %184 = vector.broadcast %cst_74 : f32 to vector<8x128xf32>
    %185 = arith.addf %183, %184 : vector<8x128xf32>
    %186 = arith.mulf %185, %172 : vector<8x128xf32>
    %cst_75 = arith.constant 0.000000e+00 : f32
    %187 = vector.broadcast %cst_75 : f32 to vector<8x128xf32>
    %188 = arith.subf %187, %166 : vector<8x128xf32>
    %189 = arith.mulf %188, %166 : vector<8x128xf32>
    %190 = math.exp %189 : vector<8x128xf32>
    %191 = arith.mulf %186, %190 : vector<8x128xf32>
    %cst_76 = arith.constant 1.000000e+00 : f32
    %192 = vector.broadcast %cst_76 : f32 to vector<8x128xf32>
    %193 = arith.subf %192, %191 : vector<8x128xf32>
    %cst_77 = arith.constant 0.000000e+00 : f32
    %194 = vector.broadcast %cst_77 : f32 to vector<8x128xf32>
    %195 = arith.cmpf oge, %165, %194 : vector<8x128xf32>
    %cst_78 = arith.constant 0.000000e+00 : f32
    %196 = vector.broadcast %cst_78 : f32 to vector<8x128xf32>
    %197 = arith.subf %196, %193 : vector<8x128xf32>
    %198 = arith.select %195, %193, %197 : vector<8x128xi1>, vector<8x128xf32>
    %cst_79 = arith.constant 1.000000e+00 : f32
    %199 = vector.broadcast %cst_79 : f32 to vector<8x128xf32>
    %200 = arith.addf %199, %198 : vector<8x128xf32>
    %201 = arith.mulf %163, %200 : vector<8x128xf32>
    %202 = arith.truncf %201 : vector<8x128xf32> to vector<8x128xbf16>
    %c0_80 = arith.constant 0 : index
    %c0_81 = arith.constant 0 : index
    %203 = vector.load %arg16[%c0_80, %c0_81] : memref<128x32xbf16, #tpu.memory_space<vmem>>, vector<128x32xbf16>
    %cst_82 = arith.constant dense<0.000000e+00> : vector<8x32xf32>
    %204 = tpu.matmul %202, %203, %cst_82 {dimension_numbers = #tpu.dot_dimension_numbers<[1], [0], [0], [1], [0, 0, 1, 1], [], []>} : vector<8x128xbf16>, vector<128x32xbf16>, vector<8x32xf32> -> vector<8x32xf32>
    %c0_83 = arith.constant 0 : index
    %c0_84 = arith.constant 0 : index
    %205 = vector.load %arg17[%c0_83, %c0_84] : memref<1x32xf32, #tpu.memory_space<vmem>>, vector<1x32xf32>
    %206 = vector.broadcast %205 : vector<1x32xf32> to vector<8x32xf32>
    %207 = arith.addf %204, %206 : vector<8x32xf32>
    %208 = arith.addf %207, %131 : vector<8x32xf32>
    %c0_85 = arith.constant 0 : index
    %c0_86 = arith.constant 0 : index
    %c0_87 = arith.constant 0 : index
    %209 = vector.load %arg18[%c0_85, %c0_86, %c0_87] : memref<1x8x32xf32, #tpu.memory_space<vmem>>, vector<1x8x32xf32>
    %210 = vector.shape_cast %209 : vector<1x8x32xf32> to vector<8x32xf32>
    %211 = vector.shape_cast %208 : vector<8x32xf32> to vector<1x8x32xf32>
    tpu.vector_store %arg18[%c0_85, %c0_86, %c0_87], %211 {strides = array<i32>} : memref<1x8x32xf32, #tpu.memory_space<vmem>>, vector<1x8x32xf32>,
    return
  }
  func.func @transform_0(%arg0: i32) -> (i32, i32, i32) {
    %c0_i32 = arith.constant 0 : i32
    %c0_i32_0 = arith.constant 0 : i32
    %c0_i32_1 = arith.constant 0 : i32
    return %arg0, %c0_i32, %c0_i32_0 : i32, i32, i32
  }
  func.func @transform_1(%arg0: i32) -> (i32, i32) {
    %c0_i32 = arith.constant 0 : i32
    %c0_i32_0 = arith.constant 0 : i32
    %c0_i32_1 = arith.constant 0 : i32
    return %c0_i32, %c0_i32_0 : i32, i32
  }
  func.func @transform_2(%arg0: i32) -> (i32, i32) {
    %c0_i32 = arith.constant 0 : i32
    %c0_i32_0 = arith.constant 0 : i32
    %c0_i32_1 = arith.constant 0 : i32
    return %c0_i32, %c0_i32_0 : i32, i32
  }
  func.func @transform_3(%arg0: i32) -> (i32, i32, i32) {
    %c0_i32 = arith.constant 0 : i32
    %c0_i32_0 = arith.constant 0 : i32
    %c0_i32_1 = arith.constant 0 : i32
    %c0_i32_2 = arith.constant 0 : i32
    return %c0_i32, %c0_i32_0, %c0_i32_1 : i32, i32, i32
  }
  func.func @transform_4(%arg0: i32) -> (i32, i32, i32) {
    %c0_i32 = arith.constant 0 : i32
    %c0_i32_0 = arith.constant 0 : i32
    %c0_i32_1 = arith.constant 0 : i32
    %c0_i32_2 = arith.constant 0 : i32
    return %c0_i32, %c0_i32_0, %c0_i32_1 : i32, i32, i32
  }
  func.func @transform_5(%arg0: i32) -> (i32, i32, i32) {
    %c0_i32 = arith.constant 0 : i32
    %c0_i32_0 = arith.constant 0 : i32
    %c0_i32_1 = arith.constant 0 : i32
    %c0_i32_2 = arith.constant 0 : i32
    return %c0_i32, %c0_i32_0, %c0_i32_1 : i32, i32, i32
  }
  func.func @transform_6(%arg0: i32) -> (i32, i32) {
    %c0_i32 = arith.constant 0 : i32
    %c0_i32_0 = arith.constant 0 : i32
    %c0_i32_1 = arith.constant 0 : i32
    return %c0_i32, %c0_i32_0 : i32, i32
  }
  func.func @transform_7(%arg0: i32) -> (i32, i32) {
    %c0_i32 = arith.constant 0 : i32
    %c0_i32_0 = arith.constant 0 : i32
    %c0_i32_1 = arith.constant 0 : i32
    return %c0_i32, %c0_i32_0 : i32, i32
  }
  func.func @transform_8(%arg0: i32) -> (i32, i32, i32) {
    %c0_i32 = arith.constant 0 : i32
    %c0_i32_0 = arith.constant 0 : i32
    %c0_i32_1 = arith.constant 0 : i32
    %c0_i32_2 = arith.constant 0 : i32
    return %c0_i32, %c0_i32_0, %c0_i32_1 : i32, i32, i32
  }
  func.func @transform_9(%arg0: i32) -> (i32, i32, i32) {
    %c0_i32 = arith.constant 0 : i32
    %c0_i32_0 = arith.constant 0 : i32
    %c0_i32_1 = arith.constant 0 : i32
    %c0_i32_2 = arith.constant 0 : i32
    return %c0_i32, %c0_i32_0, %c0_i32_1 : i32, i32, i32
  }
  func.func @transform_10(%arg0: i32) -> (i32, i32, i32) {
    %c0_i32 = arith.constant 0 : i32
    %c0_i32_0 = arith.constant 0 : i32
    %c0_i32_1 = arith.constant 0 : i32
    %c0_i32_2 = arith.constant 0 : i32
    return %c0_i32, %c0_i32_0, %c0_i32_1 : i32, i32, i32
  }
  func.func @transform_11(%arg0: i32) -> (i32, i32) {
    %c0_i32 = arith.constant 0 : i32
    %c0_i32_0 = arith.constant 0 : i32
    %c0_i32_1 = arith.constant 0 : i32
    return %c0_i32, %c0_i32_0 : i32, i32
  }
  func.func @transform_12(%arg0: i32) -> (i32, i32) {
    %c0_i32 = arith.constant 0 : i32
    %c0_i32_0 = arith.constant 0 : i32
    %c0_i32_1 = arith.constant 0 : i32
    return %c0_i32, %c0_i32_0 : i32, i32
  }
  func.func @transform_13(%arg0: i32) -> (i32, i32) {
    %c0_i32 = arith.constant 0 : i32
    %c0_i32_0 = arith.constant 0 : i32
    %c0_i32_1 = arith.constant 0 : i32
    return %c0_i32, %c0_i32_0 : i32, i32
  }
  func.func @transform_14(%arg0: i32) -> (i32, i32) {
    %c0_i32 = arith.constant 0 : i32
    %c0_i32_0 = arith.constant 0 : i32
    %c0_i32_1 = arith.constant 0 : i32
    return %c0_i32, %c0_i32_0 : i32, i32
  }
  func.func @transform_15(%arg0: i32) -> (i32, i32) {
    %c0_i32 = arith.constant 0 : i32
    %c0_i32_0 = arith.constant 0 : i32
    %c0_i32_1 = arith.constant 0 : i32
    return %c0_i32, %c0_i32_0 : i32, i32
  }
  func.func @transform_16(%arg0: i32) -> (i32, i32) {
    %c0_i32 = arith.constant 0 : i32
    %c0_i32_0 = arith.constant 0 : i32
    %c0_i32_1 = arith.constant 0 : i32
    return %c0_i32, %c0_i32_0 : i32, i32
  }
  func.func @transform_17(%arg0: i32) -> (i32, i32, i32) {
    %c0_i32 = arith.constant 0 : i32
    %c0_i32_0 = arith.constant 0 : i32
    %c0_i32_1 = arith.constant 0 : i32
    return %arg0, %c0_i32, %c0_i32_0 : i32, i32, i32
  }
}

</mosaic_0001>

<bundles_post_ra>
// kernel: _gptr_forward.5
= control target key start
LH: loop header
LB: loop body
LE: loop exit
PB: predicated region body
PF: predicated region fallthrough
CT: control target
= control target key end

     0   :  { %10 = vsyncpa [#allocation3], 0  ;;  %s701_s0 = inlined_call_operand.vmem [shape: f32[2,8,32], index: 0, kind: input, shape index: {}]   ;;  %s702_s1 = inlined_call_operand.vmem [shape: f32[1,32], index: 1, kind: input, shape index: {}]   ;;  %s703_s2 = inlined_call_operand.vmem [shape: f32[1,32], index: 2, kind: input, shape index: {}]   ;;  %s704_s3 = inlined_call_operand.vmem [shape: bf16[32,64], index: 3, kind: input, shape index: {}]   ;;  %s705_s4 = inlined_call_operand.vmem [shape: f32[1,64], index: 4, kind: input, shape index: {}]   ;;  %s706_s5 = inlined_call_operand.hbm [shape: f32[2,8,64], index: 5, kind: output, shape index: {}]  }
   0x1   :  { %12 = vsyncpa [#allocation3 + $0x1], 0  ;;  %s580_s18 = smov 0   ;;  %s582_s19 = smov 0  }
   0x2   :  { %s584_s20 = smov 0   ;;  %s586_s21 = smov 0  }
   0x3 LB: > { %s601_s22 = sadd.s32 4294967295, %s545_s21   ;;  %s407_s23 = sadd.s32 4294967294, %s545_s21   ;;  %s545_s21 = sphi %s586_s21, %s712_s21   ;;  %s541_s20 = sphi %s584_s20, %s711_s20   ;;  %s537_s19 = sphi %s582_s19, %s710_s19   ;;  %s533_s18 = sphi %s580_s18, %s709_s18  }
   0x4   : > { %s605_s24 = sadd.s32 1, %s545_s21   ;;  %s135_s25 = sadd.s32 1, %s541_s20 }
   0x5   : > { %s132_s26 = ssub.s32 %s545_s21, %s605_s24  ;;  %p145_p0 = scmp.ne.s32.totalorder %s541_s20, %s537_s19 }
   0x6   : > { %p133_p1 = scmp.eq.s32.totalorder %s132_s26, 0  ;;  %p146_p2 = scmp.eq.s32.totalorder %s601_s22, 1 }
   0x7   : > { %p151_p3 = scmp.ne.s32.totalorder %s537_s19, %s533_s18  ;;  %p152_p4 = scmp.eq.s32.totalorder %s407_s23, 1 }
   0x8   : > { %s616_s27 = scalar_select %p133_p1, %s541_s20, %s135_s25  }
   0x9   : > { %p618_p5 = por %p146_p2, %p145_p0  ;;  %p622_p6 = por %p152_p4, %p151_p3 }
   0xa   : > { %p410_p7 = scmp.ge.s32.totalorder %s545_s21, 1  ;;  %p189_p8 = scmp.lt.s32.totalorder %s545_s21, 3 }
   0xc   : > { %p190_p9 = pnand %p410_p7, %p189_p8 }
   0xd   : > { %p216_p10 = scmp.lt.s32.totalorder (!%p190_p9), %s601_s22, 1  ;;  %vm224_vm0 = vcmask (!%p190_p9), 261120   ;;  %v475_v7 = vld [vmem:[%s704_s3] sm:$0xff] (!%p190_p9)   ;;  %v547_v8 = vmov (!%p190_p9), 0.0   ;;  %v476_v9 = vld [vmem:[%s704_s3 + $0x8] sm:$0xff] (!%p190_p9)   ;;  %vm548_vm1 = vmmov (!%p190_p9), 0  }
   0xe   : > { %193 = sbr.rel (%p190_p9) target bundleno = 885 (0x375), region = 40  ;;  %426 = vmatprep.subr.bf16.mxu0 (!%p190_p9), %v547_v8  ;;  %430 = vmatprep.mubr.msk.bf16.mxu0 (!%p190_p9), %vm548_vm1, %v547_v8  ;;  %v413_v14 = vld [vmem:[%s702_s1] ss:$0 sm:$0xff] (!%p190_p9)  ;;  %vm320_vm2 = vcmask (!%p190_p9), 523264   ;;  %s213_s26 = sand.u32 (!%p190_p9), 1, %s537_s19  }
   0xf   : > { %427 = vmatpush3.bf16.msra.mxu0 (!%p190_p9), %v475_v7  ;;  %v414_v16 = vld [vmem:[%s703_s2] ss:$0 sm:$0xff] (!%p190_p9)  ;;  %s335_s12 = scalar_lea.sflag (!%p190_p9), [#allocation3], %s213_s26 }
  0x10   : > { %428 = vmatprep.subr.bf16.mxu0 (!%p190_p9), %v547_v8  ;;  %v415_v20 = vld [vmem:[%s705_s4] ss:$0 sm:$0xff] (!%p190_p9) }
  0x13   : > { %429 = vmatpush3.bf16.msra.mxu0 (!%p190_p9), %v476_v9 }
  0x15   : > { %s217_s30 = scalar_select %p216_p10, %s601_s22, 1 }
  0x17   : > { %s412_s6 = sshll.u32 %s217_s30, 3  ;;  %s411_s30 = sshll.u32 %s213_s26, 3 }
  0x18   : > { %s219_s9 = scalar_lea.vmem %s701_s0, %s412_s6  ;;  %s420_s6 = sshll.u32 %s601_s22, 7 }
  0x19   : > { %v221_v0 = vld [vmem:[%s219_s9] sm:$0xff]  ;;  %s215_s7 = scalar_lea.vmem [#allocation2], %s411_s30  ;;  %s658_s11 = scalar_lea.hbm %s706_s5, %s420_s6 }
  0x1a   : > { %v225_v1 = vsel %vm224_vm0, %v221_v0, 0.0  ;;  %s348_s8 = sshll.u32 %s215_s7, 4  ;;  %s549_s22 = smov [#allocation2]   ;;  %s660_s8 = int_to_ptr.vmem [resolvable:$true] %s348_s8 }
  0x1b   : > { %226 = vadd.xlane.f32.xlu0 %v225_v1  ;;  %s483_s13 = scalar_lea.vmem %s660_s8, 128  ;;  %s487_s14 = sshll.u32 %s549_s22, 4  ;;  %s488_s14 = int_to_ptr.vmem [resolvable:$false] %s487_s14 }
  0x1c   : > { %p484_p11 = scmp.ne.s32.totalorder %s660_s8, %s483_s13  ;;  %s489_s15 = scalar_lea.vmem %s488_s14, 256 }
  0x1d   : > { %p490_p0 = scmp.lt.s32.totalorder %s660_s8, %s488_s14  ;;  %p491_p1 = scmp.lt.s32.totalorder %s489_s15, %s483_s13 }
  0x1e   : > { %p485_p12 = pnand %p484_p11, %p618_p5 }
  0x1f   : > { %p492_p2 = por %p491_p1, %p490_p0 }
  0x20   : > { %p486_p13 = pneg %p485_p12 }
  0x22   : > { %p493_p3 = pnand %p492_p2, %p486_p13 }
  0xa8   : > { %v227_v2 = vpop.xlane.xlu0 %226 }
  0xa9   : > { %v229_v3 = vmul.f32 0.03125, %v227_v2 }
  0xab   : > { %v230_v4 = vsub.f32 %v221_v0, %v229_v3 }
  0xad   : > { %v231_v5 = vmul.f32 %v230_v4, %v230_v4 }
  0xaf   : > { %v232_v6 = vsel %vm224_vm0, %v231_v5, 0.0 }
  0xb0   : > { %233 = vadd.xlane.f32.xlu0 %v232_v6 }
 0x13d   : > { %v234_v10 = vpop.xlane.xlu0 %233 }
 0x13e   : > { %v235_v11 = vmul.f32 0.03125, %v234_v10 }
 0x140   : > { %v236_v12 = vadd.f32 1e-05, %v235_v11 }
 0x142   : > { %477 = vrsqrt.f32 %v236_v12 }
 0x14c   : > { %v478_v13 = vpop.eup %477 }
 0x14d   : > { %v238_v15 = vmul.f32 %v478_v13, %v230_v4 }
 0x14f   : > { %v245_v17 = vmul.f32 %v413_v14, %v238_v15 }
 0x151   : > { %v252_v18 = vadd.f32 %v414_v16, %v245_v17 }
 0x153   : > { %v253_v19 = vpack.c.bf16 %v252_v18, %v252_v18 }
 0x155   : > { %431 = vmatmul.mubr.msk.bf16.vlgmr.msra.gmra.mrb[0].mxu0 %vm224_vm0, %v253_v19 }
 0x228   : > { %v314_v21 = vpop.f32.mrb[0].mxu0 }
 0x229   : > { %v315_v22 = vadd.f32 %v415_v20, %v314_v21  ;;  %v432_v23 = vpop.f32.mrb[1].mxu0 }
 0x22a   : > { %v317_v24 = vpop.f32.mrb[2].mxu0 }
 0x22b   : > { %v433_v25 = vpop.f32.mrb[3].mxu0  ;;  %v321_v26 = vsel %vm320_vm2, %v315_v22, -inf }
 0x22c   : > { %322 = vmax.xlane.f32.xlu1 %v321_v26 }
 0x2b9   : > { %v323_v27 = vpop.xlane.xlu1 %322 }
 0x2ba   : > { %v324_v28 = vsub.f32 %v315_v22, %v323_v27 }
 0x2bc   : > { %v325_v29 = vmul.f32 1.442695, %v324_v28 }
 0x2be   : > { %479 = vpow2.f32 %v325_v29 }
 0x2c8   : > { %v480_v30 = vpop.eup %479 }
 0x2c9   : > { %v327_v31 = vsel %vm320_vm2, %v480_v30, 0.0 }
 0x2ca   : > { %328 = vadd.xlane.f32.xlu1 %v327_v31 }
 0x357   : > { %v329_v32 = vpop.xlane.xlu1 %328 }
 0x358   : > { %481 = vlog2.f32 %v329_v32 }
 0x362   : > { %v482_v33 = vpop.eup %481 }
 0x363   : > { %v331_v34 = vmul.f32 0.6931472, %v482_v33 }
 0x365   : > { %v332_v35 = vsub.f32 %v324_v28, %v331_v34 }
 0x367   : > { %333 = vst.msk [vmem:[%s215_s7] sm:$0xff] %vm320_vm2, %v332_v35 }
 0x368   : > { %496 = shalt.err (!%p493_p3)
}
 0x369   : > { %s497_s16 = scalar_lea.hbm %s658_s11, 128  ;;  %s501_s25 = scalar_lea.hbm %s706_s5, 256 }
 0x36a   : > { %p498_p4 = scmp.ne.s32.totalorder %s658_s11, %s497_s16  ;;  %p502_p9 = scmp.lt.u32.totalorder %s658_s11, %s706_s5 }
 0x36b   : > { %p503_p10 = scmp.lt.u32.totalorder %s501_s25, %s497_s16  ;;  %p505_p12 = scmp.lt.u32.totalorder %s497_s16, %s658_s11 }
 0x36c   : > { %p499_p7 = pnand %p498_p4, %p618_p5 }
 0x36d   : > { %p504_p11 = por %p503_p10, %p502_p9 }
 0x36e   : > { %p500_p8 = pneg %p499_p7 }
 0x36f   : > { %p506_p13 = por %p505_p12, %p504_p11 }
 0x371   : > { %p507_p0 = pnand %p506_p13, %p500_p8 }
 0x373   : > { %510 = shalt.err (!%p507_p0)
}
 0x374   : > { %434 = dma.vmem_to_hbm [thread:$0]  (%p618_p5), %s660_s8, 128, %s658_s11, %s335_s12  }
 0x375 PF: > { %p440_p1 = scmp.ge.s32.totalorder %s545_s21, 2  ;;  %s360_s6 = sand.u32 1, %s533_s18  }
 0x376   : > { %s361_s7 = scalar_lea.sflag [#allocation3], %s360_s6 }
 0x377   : > { %p437_p2 = pnand %p440_p1, %p622_p6 }
 0x379   : > { %528 = dma.done.wait (!%p437_p2), %s361_s7, 128  }
 0x37a   : > { %530 = vsyncadd (!%p437_p2), %s361_s7, 4294967168  ;;  %p15_p3 = scmp.ge.s32.totalorder %s605_s24, 4   ;;  %s709_s18 = smov %s537_s19 }
 0x37b   : > { %s710_s19 = smov %s541_s20  ;;  %s711_s20 = smov %s616_s27 }
 0x37c   : > { %s712_s21 = smov %s605_s24  ;;  %17 = sbr.rel (!%p15_p3) target bundleno = 3 (0x3), region = 75 }
 0x383   :  { %366 = vsyncpa [#allocation3], 1 }
 0x384   :  { %368 = vsyncpa [#allocation3 + $0x1], 1 }

// kernel: _gptr_forward.3
= control target key start
LH: loop header
LB: loop body
LE: loop exit
PB: predicated region body
PF: predicated region fallthrough
CT: control target
= control target key end

     0   :  { %s3012_s24 = smov 0   ;;  %s3504_s0 = inlined_call_operand.vmem [shape: f32[2,8,32], index: 0, kind: input, shape index: {}, may-alias: {0,17}]   ;;  %s3505_s1 = inlined_call_operand.vmem [shape: f32[1,32], index: 1, kind: input, shape index: {}]   ;;  %s3506_s2 = inlined_call_operand.vmem [shape: f32[1,32], index: 2, kind: input, shape index: {}]   ;;  %s3507_s3 = inlined_call_operand.vmem [shape: bf16[4,32,8], index: 3, kind: input, shape index: {}]   ;;  %s3508_s4 = inlined_call_operand.vmem [shape: bf16[4,32,8], index: 4, kind: input, shape index: {}]   ;;  %s3509_s5 = inlined_call_operand.vmem [shape: bf16[4,32,8], index: 5, kind: input, shape index: {}]   ;;  %s3510_s6 = inlined_call_operand.vmem [shape: f32[8,4], index: 6, kind: input, shape index: {}]   ;;  %s3511_s7 = inlined_call_operand.vmem [shape: f32[8,4], index: 7, kind: input, shape index: {}]   ;;  %s3512_s8 = inlined_call_operand.vmem [shape: f32[4,1,8], index: 8, kind: input, shape index: {}]   ;;  %s3513_s9 = inlined_call_operand.vmem [shape: f32[4,1,8], index: 9, kind: input, shape index: {}]   ;;  %s3514_s10 = inlined_call_operand.vmem [shape: bf16[4,8,32], index: 10, kind: input, shape index: {}]   ;;  %s3515_s11 = inlined_call_operand.vmem [shape: f32[1,32], index: 11, kind: input, shape index: {}]   ;;  %s3516_s12 = inlined_call_operand.vmem [shape: f32[1,32], index: 12, kind: input, shape index: {}]   ;;  %s3517_s13 = inlined_call_operand.vmem [shape: bf16[32,128], index: 13, kind: input, shape index: {}]   ;;  %s3518_s14 = inlined_call_operand.vmem [shape: f32[1,128], index: 14, kind: input, shape index: {}]   ;;  %s3519_s15 = inlined_call_operand.vmem [shape: bf16[128,32], index: 15, kind: input, shape index: {}]   ;;  %s3520_s16 = inlined_call_operand.vmem [shape: f32[1,32], index: 16, kind: input, shape index: {}]   ;;  %s3521_s17 = inlined_call_operand.vmem [shape: f32[2,8,32], index: 17, kind: output, shape index: {}, may-alias: {0,17}]  }
   0x1   :  { %3522 = sst [smem:[#allocation2_spill]] %s3504_s0 }
   0x2   :  { %3523 = sst [smem:[#allocation3_spill]] %s3505_s1 }
   0x3 LB: > { %s2474_s25 = sadd.s32 4294967295, %s2916_s24   ;;  %p2478_p0 = scmp.ge.s32.totalorder %s2916_s24, 1  ;;  %s2916_s24 = sphi %s3012_s24, %s27_s24  }
   0x4   : > { %p486_p1 = scmp.lt.s32.totalorder %s2916_s24, 3 }
   0x6   : > { %p487_p2 = pnand %p2478_p0, %p486_p1 }
   0x7   : > { %p536_p3 = scmp.lt.s32.totalorder (!%p487_p2), %s2474_s25, 1  ;;  %vm548_vm0 = vcmask (!%p487_p2), 261120   ;;  %s3524_s29 = sld [smem:[#allocation2_spill]] (!%p487_p2)  ;;  %v2851_v7 = vld [vmem:[%s3507_s3] sm:$0xff] (!%p487_p2)   ;;  %v2852_v8 = vld [vmem:[%s3507_s3 + $0x30] sm:$0xff] (!%p487_p2)   ;;  %v2918_v9 = vmov (!%p487_p2), 0.0  }
   0x8   : > { %490 = sbr.rel (%p487_p2) target bundleno = 2587 (0xa1b), region = 88  ;;  %2628 = vmatprep.subr.bf16.mxu0 (!%p487_p2), %v2918_v9  ;;  %2652 = vmatprep.subr.bf16.mxu1 (!%p487_p2), %v2918_v9  ;;  %v2853_v10 = vld [vmem:[%s3507_s3 + $0x8] sm:$0xff] (!%p487_p2)   ;;  %v2854_v11 = vld [vmem:[%s3507_s3 + $0x38] sm:$0xff] (!%p487_p2)   ;;  %vm2919_vm1 = vmmov (!%p487_p2), 0   ;;  %v3058_v12 = vld [vmem:[%s3510_s6] sm:$0xff] (!%p487_p2)  ;;  %s3525_s20 = sld [smem:[#allocation3_spill]] (!%p487_p2) }
   0x9   : > { %2629 = vmatpush3.bf16.msra.mxu0 (!%p487_p2), %v2851_v7  ;;  %2653 = vmatpush3.bf16.msra.mxu1 (!%p487_p2), %v2852_v8  ;;  %v3065_v13 = vld [vmem:[%s3511_s7] sm:$0xff] (!%p487_p2)  ;;  %v2855_v23 = vld [vmem:[%s3507_s3 + $0x10] sm:$0xff] (!%p487_p2)   ;;  %v2857_v26 = vld [vmem:[%s3507_s3 + $0x18] sm:$0xff] (!%p487_p2)   ;;  %s2921_s23 = smov (!%p487_p2), 124   ;;  %vm1335_vm2 = vcmask (!%p487_p2), 31744   ;;  %vm1485_vm3 = vcmask (!%p487_p2), 64512  }
   0xa   : > { %2630 = vmatprep.subr.bf16.mxu0 (!%p487_p2), %v2918_v9  ;;  %2654 = vmatprep.subr.bf16.mxu1 (!%p487_p2), %v2918_v9  ;;  %v2482_v20 = vld [vmem:[%s3506_s2] ss:$0 sm:$0xff] (!%p487_p2)  ;;  %v2856_v24 = vld [vmem:[%s3508_s4 + $0x10] sm:$0xff] (!%p487_p2)   ;;  %v2858_v27 = vld [vmem:[%s3508_s4 + $0x18] sm:$0xff] (!%p487_p2)   ;;  %vm1685_vm4 = vcmask (!%p487_p2), 1043456  }
   0xb   : > { %2632 = vmatprep.mubr.msk.bf16.mxu0 (!%p487_p2), %vm2919_vm1, %v2918_v9  ;;  %2656 = vmatprep.mubr.msk.bf16.mxu1 (!%p487_p2), %vm2919_vm1, %v2918_v9  ;;  %v2859_v28 = vld [vmem:[%s3507_s3 + $0x20] sm:$0xff] (!%p487_p2)   ;;  %v2860_v29 = vld [vmem:[%s3508_s4 + $0x30] sm:$0xff] (!%p487_p2)   ;;  %v2861_v30 = vld [vmem:[%s3507_s3 + $0x28] sm:$0xff] (!%p487_p2)  }
   0xc   : > { %v2862_v31 = vld [vmem:[%s3508_s4 + $0x38] sm:$0xff] (!%p487_p2)   ;;  %v2863_v32 = vld [vmem:[%s3508_s4] sm:$0xff] (!%p487_p2)   ;;  %v2864_v33 = vld [vmem:[%s3509_s5 + $0x10] sm:$0xff] (!%p487_p2)  }
   0xd   : > { %2631 = vmatpush3.bf16.msra.mxu0 (!%p487_p2), %v2853_v10  ;;  %2655 = vmatpush3.bf16.msra.mxu1 (!%p487_p2), %v2854_v11  ;;  %v2865_v34 = vld [vmem:[%s3508_s4 + $0x8] sm:$0xff] (!%p487_p2)   ;;  %v2866_v35 = vld [vmem:[%s3509_s5 + $0x18] sm:$0xff] (!%p487_p2)   ;;  %v2867_v36 = vld [vmem:[%s3508_s4 + $0x20] sm:$0xff] (!%p487_p2)  }
   0xe   : > { %2636 = vmatprep.subr.bf16.mxu0 (!%p487_p2), %v2918_v9  ;;  %2668 = vmatprep.subr.bf16.mxu1 (!%p487_p2), %v2918_v9  ;;  %v2481_v18 = vld [vmem:[%s3525_s20] ss:$0 sm:$0xff] (!%p487_p2)  ;;  %v2868_v37 = vld [vmem:[%s3509_s5 + $0x30] sm:$0xff] (!%p487_p2)   ;;  %v2869_v38 = vld [vmem:[%s3508_s4 + $0x28] sm:$0xff] (!%p487_p2)  }
   0xf   : > { %s3527_s25 = smov (!%p536_p3, %s2474_s25), 1  ;;  %v2870_v39 = vld [vmem:[%s3509_s5 + $0x38] sm:$0xff]   ;;  %v2871_v40 = vld [vmem:[%s3509_s5] sm:$0xff]   ;;  %v2872_v41 = vld [vmem:[%s3509_s5 + $0x8] sm:$0xff]  }
  0x10   : > { %s2479_s26 = sshll.u32 %s3527_s25, 3  ;;  %v2873_v42 = vld [vmem:[%s3509_s5 + $0x20] sm:$0xff]   ;;  %v2874_v43 = vld [vmem:[%s3509_s5 + $0x28] sm:$0xff]  }
  0x11   : > { %s3028_s0 = scalar_lea.vmem %s3524_s29, %s2479_s26  ;;  %s2920_s29 = smov 4  }
  0x12   : > { %v545_v0 = vld [vmem:[%s3028_s0] sm:$0xff]  ;;  %1292 = vrot.lane.b32.xlu1 %v3058_v12, %s2920_s29  ;;  %s543_s20 = scalar_lea.vmem %s3521_s17, %s2479_s26 }
  0x13   : > { %v549_v1 = vsel %vm548_vm0, %v545_v0, 0.0 }
  0x14   : > { %550 = vadd.xlane.f32.xlu0 %v549_v1 }
  0x16   : > { %1260 = vrot.lane.b32.xlu1 %v3065_v13, %s2920_s29 }
  0x84   : > { %v1293_v52 = vpop.permute.xlu1 %1292 }
  0xa1   : > { %v551_v2 = vpop.xlane.xlu0 %550 }
  0xa2   : > { %v553_v3 = vmul.f32 0.03125, %v551_v2 }
  0xa4   : > { %v554_v4 = vsub.f32 %v545_v0, %v553_v3 }
  0xa6   : > { %v555_v5 = vmul.f32 %v554_v4, %v554_v4 }
  0xa8   : > { %v556_v6 = vsel %vm548_vm0, %v555_v5, 0.0 }
  0xa9   : > { %557 = vadd.xlane.f32.xlu0 %v556_v6 }
 0x136   : > { %v558_v14 = vpop.xlane.xlu0 %557 }
 0x137   : > { %v559_v15 = vmul.f32 0.03125, %v558_v14 }
 0x139   : > { %v560_v16 = vadd.f32 1e-05, %v559_v15 }
 0x13b   : > { %2885 = vrsqrt.f32 %v560_v16 }
 0x145   : > { %v2886_v17 = vpop.eup %2885 }
 0x146   : > { %v562_v19 = vmul.f32 %v2886_v17, %v554_v4 }
 0x148   : > { %v569_v21 = vmul.f32 %v2481_v18, %v562_v19 }
 0x14a   : > { %v576_v22 = vadd.f32 %v2482_v20, %v569_v21  ;;  %v3230_v21 = vpop.permute.xlu1 %1260 }
 0x14c   : > { %v3081_v25 = vpack.c.bf16 %v576_v22, %v576_v22 }
 0x14e   : > { %2633 = vmatmul.mubr.msk.bf16.vlgmr.msra.gmra.mrb[0].mxu0 %vm548_vm0, %v3081_v25  ;;  %2657 = vmatmul.mubr.msk.bf16.vlgmr.msra.gmra.mrb[0].mxu1 %vm548_vm0, %v3081_v25 }
 0x14f   : > { %2637 = vmatpush3.bf16.msra.mxu0 %v2855_v23  ;;  %2669 = vmatpush3.bf16.msra.mxu1 %v2856_v24 }
 0x150   : > { %2638 = vmatprep.subr.bf16.mxu0 %v2918_v9  ;;  %2670 = vmatprep.subr.bf16.mxu1 %v2918_v9 }
 0x151   : > { %2640 = vmatprep.mubr.msk.bf16.mxu0 %vm2919_vm1, %v2918_v9  ;;  %2672 = vmatprep.mubr.msk.bf16.mxu1 %vm2919_vm1, %v2918_v9 }
 0x153   : > { %2639 = vmatpush3.bf16.msra.mxu0 %v2857_v26  ;;  %2671 = vmatpush3.bf16.msra.mxu1 %v2858_v27 }
 0x154   : > { %2644 = vmatprep.subr.bf16.mxu0 %v2918_v9  ;;  %2684 = vmatprep.subr.bf16.mxu1 %v2918_v9 }
 0x156   : > { %2641 = vmatmul.mubr.msk.bf16.vlgmr.msra.gmra.mrb[4].mxu0 %vm548_vm0, %v3081_v25  ;;  %2673 = vmatmul.mubr.msk.bf16.vlgmr.msra.gmra.mrb[4].mxu1 %vm548_vm0, %v3081_v25 }
 0x157   : > { %2645 = vmatpush3.bf16.msra.mxu0 %v2859_v28  ;;  %2685 = vmatpush3.bf16.msra.mxu1 %v2860_v29 }
 0x158   : > { %2646 = vmatprep.subr.bf16.mxu0 %v2918_v9  ;;  %2686 = vmatprep.subr.bf16.mxu1 %v2918_v9 }
 0x159   : > { %2648 = vmatprep.mubr.msk.bf16.mxu0 %vm2919_vm1, %v2918_v9  ;;  %2688 = vmatprep.mubr.msk.bf16.mxu1 %vm2919_vm1, %v2918_v9 }
 0x15b   : > { %2647 = vmatpush3.bf16.msra.mxu0 %v2861_v30  ;;  %2687 = vmatpush3.bf16.msra.mxu1 %v2862_v31 }
 0x15c   : > { %2660 = vmatprep.subr.bf16.mxu0 %v2918_v9  ;;  %2700 = vmatprep.subr.bf16.mxu1 %v2918_v9 }
 0x15e   : > { %2649 = vmatmul.mubr.msk.bf16.vlgmr.msra.gmra.mrb[8].mxu0 %vm548_vm0, %v3081_v25  ;;  %2689 = vmatmul.mubr.msk.bf16.vlgmr.msra.gmra.mrb[8].mxu1 %vm548_vm0, %v3081_v25 }
 0x15f   : > { %2661 = vmatpush3.bf16.msra.mxu0 %v2863_v32  ;;  %2701 = vmatpush3.bf16.msra.mxu1 %v2864_v33 }
 0x160   : > { %2662 = vmatprep.subr.bf16.mxu0 %v2918_v9  ;;  %2702 = vmatprep.subr.bf16.mxu1 %v2918_v9 }
 0x161   : > { %2664 = vmatprep.mubr.msk.bf16.mxu0 %vm2919_vm1, %v2918_v9  ;;  %2704 = vmatprep.mubr.msk.bf16.mxu1 %vm2919_vm1, %v2918_v9 }
 0x163   : > { %2663 = vmatpush3.bf16.msra.mxu0 %v2865_v34  ;;  %2703 = vmatpush3.bf16.msra.mxu1 %v2866_v35 }
 0x164   : > { %2676 = vmatprep.subr.bf16.mxu0 %v2918_v9  ;;  %2716 = vmatprep.subr.bf16.mxu1 %v2918_v9 }
 0x166   : > { %2665 = vmatmul.mubr.msk.bf16.vlgmr.msra.gmra.mrb[12].mxu0 %vm548_vm0, %v3081_v25  ;;  %2705 = vmatmul.mubr.msk.bf16.vlgmr.msra.gmra.mrb[12].mxu1 %vm548_vm0, %v3081_v25 }
 0x167   : > { %2677 = vmatpush3.bf16.msra.mxu0 %v2867_v36  ;;  %2717 = vmatpush3.bf16.msra.mxu1 %v2868_v37 }
 0x168   : > { %2678 = vmatprep.subr.bf16.mxu0 %v2918_v9  ;;  %2718 = vmatprep.subr.bf16.mxu1 %v2918_v9 }
 0x169   : > { %2680 = vmatprep.mubr.msk.bf16.mxu0 %vm2919_vm1, %v2918_v9  ;;  %2720 = vmatprep.mubr.msk.bf16.mxu1 %vm2919_vm1, %v2918_v9 }
 0x16b   : > { %2679 = vmatpush3.bf16.msra.mxu0 %v2869_v38  ;;  %2719 = vmatpush3.bf16.msra.mxu1 %v2870_v39 }
 0x16c   : > { %2692 = vmatprep.subr.bf16.mxu0 %v2918_v9  ;;  %2730 = vmatprep.subr.bf16.mxu1 %v2918_v9 }
 0x16e   : > { %2681 = vmatmul.mubr.msk.bf16.vlgmr.msra.gmra.mrb[16].mxu0 %vm548_vm0, %v3081_v25  ;;  %2721 = vmatmul.mubr.msk.bf16.vlgmr.msra.gmra.mrb[16].mxu1 %vm548_vm0, %v3081_v25 }
 0x16f   : > { %2693 = vmatpush3.bf16.msra.mxu0 %v2871_v40  ;;  %2696 = vmatprep.mubr.msk.bf16.mxu0 %vm2919_vm1, %v2918_v9 }
 0x170   : > { %2694 = vmatprep.subr.bf16.mxu0 %v2918_v9  ;;  %2732 = vmatprep.mubr.msk.bf16.mxu1 %vm2919_vm1, %v2918_v9 }
 0x173   : > { %2695 = vmatpush3.bf16.msra.mxu0 %v2872_v41 }
 0x174   : > { %2708 = vmatprep.subr.bf16.mxu0 %v2918_v9 }
 0x176   : > { %2697 = vmatmul.mubr.msk.bf16.vlgmr.msra.gmra.mrb[20].mxu0 %vm548_vm0, %v3081_v25 }
 0x177   : > { %2709 = vmatpush3.bf16.msra.mxu0 %v2873_v42  ;;  %2712 = vmatprep.mubr.msk.bf16.mxu0 %vm2919_vm1, %v2918_v9 }
 0x178   : > { %2710 = vmatprep.subr.bf16.mxu0 %v2918_v9 }
 0x17b   : > { %2711 = vmatpush3.bf16.msra.mxu0 %v2874_v43 }
 0x17c   : > { %2724 = vmatprep.subr.bf16.mxu0 %v2918_v9 }
 0x17e   : > { %2713 = vmatmul.mubr.msk.bf16.vlgmr.msra.gmra.mrb[24].mxu0 %vm548_vm0, %v3081_v25 }
 0x17f   : > { %2726 = vmatprep.mubr.msk.bf16.mxu0 %vm2919_vm1, %v2918_v9 }
 0x221   : > { %v3205_v44 = vpop.f32.mrb[0].mxu0  ;;  %v3207_v45 = vpop.f32.mrb[0].mxu1 }
 0x222   : > { %v2634_v46 = vpop.f32.mrb[1].mxu0  ;;  %v2658_v47 = vpop.f32.mrb[1].mxu1  ;;  %v1295_v62 = vmul.f32 %v1293_v52, %v3205_v44  ;;  %v1298_v20 = vmul.f32 %v1293_v52, %v3207_v45  ;;  %v1263_v32 = vmul.f32 %v3230_v21, %v3205_v44 }
 0x223   : > { %v646_v48 = vpop.f32.mrb[2].mxu0  ;;  %v802_v49 = vpop.f32.mrb[2].mxu1 }
 0x224   : > { %v2635_v50 = vpop.f32.mrb[3].mxu0  ;;  %v2659_v51 = vpop.f32.mrb[3].mxu1 }
 0x229   : > { %v3209_v53 = vpop.f32.mrb[4].mxu0  ;;  %v3211_v54 = vpop.f32.mrb[4].mxu1 }
 0x22a   : > { %v2642_v55 = vpop.f32.mrb[5].mxu0  ;;  %v2674_v56 = vpop.f32.mrb[5].mxu1  ;;  %v1373_v57 = vmul.f32 %v1293_v52, %v3211_v54  ;;  %v1296_v3 = vmul.f32 %v1293_v52, %v3209_v53  ;;  %v1345_v26 = vmul.f32 %v3230_v21, %v3211_v54  ;;  %v1264_v36 = vmul.f32 %v3230_v21, %v3209_v53 }
 0x22b   : > { %v698_v58 = vpop.f32.mrb[6].mxu0  ;;  %v922_v59 = vpop.f32.mrb[6].mxu1  ;;  %v1369_v51 = vmul.f32 %v3065_v13, %v3211_v54 }
 0x22c   : > { %1382 = vrot.lane.b32.xlu1 %v1373_v57, %s2921_s23  ;;  %v2643_v60 = vpop.f32.mrb[7].mxu0  ;;  %v2675_v61 = vpop.f32.mrb[7].mxu1 }
 0x22d   : > { %v1287_v60 = vmul.f32 %v3065_v13, %v3205_v44 }
 0x230   : > { %1303 = vrot.lane.b32.xlu1 %v1295_v62, %s2921_s23 }
 0x231   : > { %v3217_v63 = vpop.f32.mrb[8].mxu0  ;;  %v3219_v0 = vpop.f32.mrb[8].mxu1 }
 0x232   : > { %v2650_v1 = vpop.f32.mrb[9].mxu0  ;;  %v2690_v2 = vpop.f32.mrb[9].mxu1  ;;  %v1375_v33 = vmul.f32 %v1293_v52, %v3219_v0  ;;  %v1297_v37 = vmul.f32 %v1293_v52, %v3217_v63  ;;  %v1347_v40 = vmul.f32 %v3230_v21, %v3219_v0  ;;  %v1265_v46 = vmul.f32 %v3230_v21, %v3217_v63 }
 0x233   : > { %v750_v4 = vpop.f32.mrb[10].mxu0  ;;  %v1026_v5 = vpop.f32.mrb[10].mxu1 }
 0x234   : > { %v2691_v6 = vpop.f32.mrb[11].mxu1  ;;  %1305 = vrot.lane.b32.xlu1 %v1296_v3, %s2921_s23  ;;  %v2651_v7 = vpop.f32.mrb[11].mxu0  ;;  %v1288_v4 = vmul.f32 %v3065_v13, %v3209_v53 }
 0x235   : > { %v1371_v6 = vmul.f32 %v3065_v13, %v3219_v0 }
 0x239   : > { %v3223_v8 = vpop.f32.mrb[12].mxu0  ;;  %v3225_v10 = vpop.f32.mrb[12].mxu1 }
 0x23a   : > { %v2666_v11 = vpop.f32.mrb[13].mxu0  ;;  %v2706_v14 = vpop.f32.mrb[13].mxu1  ;;  %v1372_v15 = vmul.f32 %v1293_v52, %v3223_v8  ;;  %v1344_v41 = vmul.f32 %v3230_v21, %v3223_v8 }
 0x23b   : > { %v870_v16 = vpop.f32.mrb[14].mxu0  ;;  %v1146_v17 = vpop.f32.mrb[14].mxu1 }
 0x23c   : > { %v2707_v18 = vpop.f32.mrb[15].mxu1  ;;  %1380 = vrot.lane.b32.xlu0 %v1372_v15, %s2921_s23  ;;  %v2667_v19 = vpop.f32.mrb[15].mxu0  ;;  %v1289_v16 = vmul.f32 %v3065_v13, %v3217_v63 }
 0x23d   : > { %v1266_v19 = vmul.f32 %v3230_v21, %v3207_v45 }
 0x240   : > { %1309 = vrot.lane.b32.xlu0 %v1298_v20, %s2921_s23 }
 0x241   : > { %v3233_v22 = vpop.f32.mrb[16].mxu0  ;;  %v3235_v23 = vpop.f32.mrb[16].mxu1 }
 0x242   : > { %v2682_v24 = vpop.f32.mrb[17].mxu0  ;;  %v2722_v25 = vpop.f32.mrb[17].mxu1  ;;  %v1374_v27 = vmul.f32 %v1293_v52, %v3233_v22  ;;  %v1368_v52 = vmul.f32 %v3065_v13, %v3223_v8  ;;  %v1370_v61 = vmul.f32 %v3065_v13, %v3233_v22  ;;  %v1346_v62 = vmul.f32 %v3230_v21, %v3233_v22 }
 0x243   : > { %v974_v28 = vpop.f32.mrb[18].mxu0  ;;  %v1250_v29 = vpop.f32.mrb[18].mxu1  ;;  %v1290_v24 = vmul.f32 %v3065_v13, %v3207_v45 }
 0x244   : > { %v2723_v30 = vpop.f32.mrb[19].mxu1  ;;  %1354 = vrot.lane.b32.xlu0 %v1345_v26, %s2921_s23  ;;  %1384 = vrot.lane.b32.xlu1 %v1374_v27, %s2921_s23  ;;  %v2683_v31 = vpop.f32.mrb[19].mxu0 }
 0x245   : > { %v1341_v30 = vmul.f32 %v3058_v12, %v3211_v54  ;;  %v1340_v31 = vmul.f32 %v3058_v12, %v3223_v8  ;;  %v1255_v8 = vmul.f32 %v3058_v12, %v3205_v44  ;;  %v1343_v44 = vmul.f32 %v3058_v12, %v3219_v0 }
 0x248   : > { %1271 = vrot.lane.b32.xlu0 %v1263_v32, %s2921_s23  ;;  %1386 = vrot.lane.b32.xlu1 %v1375_v33, %s2921_s23 }
 0x249   : > { %v3247_v34 = vpop.f32.mrb[20].mxu0 }
 0x24a   : > { %v2698_v35 = vpop.f32.mrb[21].mxu0 }
 0x24b   : > { %v1094_v38 = vpop.f32.mrb[22].mxu0 }
 0x24c   : > { %1273 = vrot.lane.b32.xlu0 %v1264_v36, %s2921_s23  ;;  %1307 = vrot.lane.b32.xlu1 %v1297_v37, %s2921_s23  ;;  %v2699_v39 = vpop.f32.mrb[23].mxu0 }
 0x250   : > { %1358 = vrot.lane.b32.xlu0 %v1347_v40, %s2921_s23  ;;  %1352 = vrot.lane.b32.xlu1 %v1344_v41, %s2921_s23 }
 0x251   : > { %v3260_v42 = vpop.f32.mrb[24].mxu0 }
 0x252   : > { %v2714_v43 = vpop.f32.mrb[25].mxu0 }
 0x253   : > { %v1198_v47 = vpop.f32.mrb[26].mxu0 }
 0x254   : > { %1275 = vrot.lane.b32.xlu0 %v1265_v46, %s2921_s23  ;;  %v2715_v48 = vpop.f32.mrb[27].mxu0  ;;  %v1342_v46 = vmul.f32 %v3058_v12, %v3233_v22 }
 0x29e   : > { %v1383_v49 = vpop.permute.xlu1 %1382 }
 0x29f   : > { %v1393_v56 = vadd.f32 %v1383_v49, %v1369_v51 }
 0x2a2   : > { %v1304_v50 = vpop.permute.xlu1 %1303 }
 0x2a3   : > { %v1315_v2 = vadd.f32 %v1304_v50, %v1287_v60 }
 0x2a6   : > { %v1306_v59 = vpop.permute.xlu1 %1305 }
 0x2a7   : > { %v1316_v11 = vadd.f32 %v1306_v59, %v1288_v4 }
 0x2ae   : > { %v1381_v55 = vpop.permute.xlu0 %1380 }
 0x2af   : > { %v1392_v57 = vadd.f32 %v1381_v55, %v1368_v52  ;;  %v1256_v55 = vmul.f32 %v3058_v12, %v3209_v53 }
 0x2b1   : > { %v2836_v58 = vpack.i.bf16 %v1393_v56, %v1392_v57  ;;  %v1257_v57 = vmul.f32 %v3058_v12, %v3217_v63 }
 0x2b2   : > { %v1310_v20 = vpop.permute.xlu0 %1309 }
 0x2b3   : > { %2837 = vrot.lane.b32.xlu1 %v2836_v58, %s2920_s29  ;;  %v1318_v25 = vadd.f32 %v1310_v20, %v1290_v24 }
 0x2b6   : > { %v1385_v1 = vpop.permute.xlu1 %1384  ;;  %v1355_v26 = vpop.permute.xlu0 %1354 }
 0x2b7   : > { %v1394_v3 = vadd.f32 %v1385_v1, %v1370_v61  ;;  %1356 = vrot.lane.b32.xlu1 %v1346_v62, %s2921_s23  ;;  %v1365_v32 = vsub.f32 %v1341_v30, %v1355_v26 }
 0x2b9   : > { %v2841_v5 = vpack.i.bf16 %v1394_v3, %v1315_v2 }
 0x2ba   : > { %v1387_v7 = vpop.permute.xlu1 %1386  ;;  %v1272_v27 = vpop.permute.xlu0 %1271 }
 0x2bb   : > { %v1395_v14 = vadd.f32 %v1387_v7, %v1371_v6  ;;  %2842 = vrot.lane.b32.xlu1 %v2841_v5, %s2920_s29  ;;  %v1283_v48 = vsub.f32 %v1255_v8, %v1272_v27 }
 0x2bd   : > { %v2846_v15 = vpack.i.bf16 %v1395_v14, %v1316_v11  ;;  %v1258_v14 = vmul.f32 %v3058_v12, %v3207_v45  ;;  %v1679_v12 = vpack.c.bf16 %v3225_v10, %v3225_v10  ;;  %v1420_v10 = vlaneseq }
 0x2be   : > { %v1308_v17 = vpop.permute.xlu1 %1307  ;;  %v1274_v29 = vpop.permute.xlu0 %1273 }
 0x2bf   : > { %v1317_v18 = vadd.f32 %v1308_v17, %v1289_v16  ;;  %2847 = vrot.lane.b32.xlu1 %v2846_v15, %s2920_s29  ;;  %v1284_v61 = vsub.f32 %v1256_v55, %v1274_v29  ;;  %v1678_v15 = vpack.c.bf16 %v3247_v34, %v3247_v34  ;;  %v1733_v24 = vsel %vm1685_vm4, %v1679_v12, 0 }
 0x2c0   : > { %v1424_v26 = vand.u32 127, %v1420_v10 }
 0x2c1   : > { %1327 = vrot.lane.b32.xlu0 %v1317_v18, %s2920_s29  ;;  %v1687_v45 = vsel %vm1685_vm4, %v1678_v15, 0 }
 0x2c2   : > { %v1353_v28 = vpop.permute.xlu1 %1352  ;;  %v1359_v38 = vpop.permute.xlu0 %1358 }
 0x2c3   : > { %1277 = vrot.lane.b32.xlu1 %v1266_v19, %s2921_s23  ;;  %v1364_v33 = vsub.f32 %v1340_v31, %v1353_v28  ;;  %v1367_v62 = vsub.f32 %v1343_v44, %v1359_v38  ;;  %v1425_v28 = vcvt.s32.f32 %v1424_v26 }
 0x2c6   : > { %v1276_v52 = vpop.permute.xlu0 %1275 }
 0x2c7   : > { %1329 = vrot.lane.b32.xlu1 %v1318_v25, %s2920_s29  ;;  %v1285_v0 = vsub.f32 %v1257_v57, %v1276_v52  ;;  %v1421_v25 = vshrl.u32 %v1420_v10, 7  ;;  %v1681_v52 = vpack.c.bf16 %v3235_v23, %v3235_v23 }
 0x2c9   : > { %v1422_v27 = vcvt.s32.f32 %v1421_v25  ;;  %v1825_v23 = vsel %vm1685_vm4, %v1681_v52, 0  ;;  %v1988_v52 = vld [vmem:[%s3514_s10] sm:$0xf] }
 0x2cb   : > { %v1458_v29 = vsub.f32 %v1422_v27, %v1425_v28 }
 0x2cd   : > { %v1460_v30 = vmax.f32 %v1458_v29, 0.0  ;;  %vm1459_vm5 = vcmp.ge.f32.partialorder %v1458_v29, 0.0 }
 0x2cf   : > { %v1461_v31 = vmul.f32 -0.031748697, %v1460_v30 }
 0x325   : > { %v2838_v21 = vpop.permute.xlu1 %2837 }
 0x326   : > { %v2840_v13 = vunpack.i.h.bf16 %v2838_v21  ;;  %v2839_v35 = vunpack.i.l.bf16 %v2838_v21  ;;  %v1465_v21 = vmul.f32 1.442695, %v1461_v31 }
 0x328   : > { %v1412_v36 = vsel %vm1335_vm2, %v1364_v33, %v2839_v35  ;;  %v1413_v37 = vsel %vm1335_vm2, %v1365_v32, %v2840_v13  ;;  %v1462_v32 = vmul.f32 -0.015748357, %v1460_v30  ;;  %2887 = vpow2.f32 %v1465_v21 }
 0x329   : > { %v1357_v39 = vpop.permute.xlu1 %1356  ;;  %v1481_v40 = vpack.c.bf16 %v1412_v36, %v1412_v36  ;;  %v1482_v41 = vpack.c.bf16 %v1413_v37, %v1413_v37  ;;  %v1463_v13 = vmul.f32 -0.007843178, %v1460_v30  ;;  %v1464_v36 = vmul.f32 -0.0039138994, %v1460_v30 }
 0x32a   : > { %v1366_v49 = vsub.f32 %v1342_v46, %v1357_v39  ;;  %v1467_v33 = vmul.f32 1.442695, %v1462_v32 }
 0x32b   : > { %v1490_v54 = vsel %vm1485_vm3, %v1481_v40, 0  ;;  %v1536_v43 = vsel %vm1485_vm3, %v1482_v41, 0  ;;  %v1469_v35 = vmul.f32 1.442695, %v1463_v13  ;;  %v1471_v37 = vmul.f32 1.442695, %v1464_v36 }
 0x32c   : > { %2725 = vmatpush3.bf16.xpose.msra.mxu0 %v1490_v54  ;;  %2731 = vmatpush3.bf16.xpose.msra.mxu1 %v1536_v43  ;;  %2889 = vpow2.f32 %v1467_v33  ;;  %v1680_v54 = vpack.c.bf16 %v3260_v42, %v3260_v42 }
 0x32d   : > { %v2843_v47 = vpop.permute.xlu1 %2842  ;;  %2736 = vmatprep.subr.bf16.mxu0 %v2918_v9  ;;  %2742 = vmatprep.subr.bf16.mxu1 %v2918_v9  ;;  %2891 = vpow2.f32 %v1469_v35 }
 0x32e   : > { %v2845_v50 = vunpack.i.h.bf16 %v2843_v47  ;;  %v2844_v51 = vunpack.i.l.bf16 %v2843_v47  ;;  %2893 = vpow2.f32 %v1471_v37  ;;  %v1779_v55 = vsel %vm1685_vm4, %v1680_v54, 0 }
 0x330   : > { %v1336_v22 = vsel %vm1335_vm2, %v1283_v48, %v2844_v51  ;;  %v1414_v56 = vsel %vm1335_vm2, %v1366_v49, %v2845_v50 }
 0x331   : > { %v1477_v58 = vpack.c.bf16 %v1336_v22, %v1336_v22  ;;  %v2848_v59 = vpop.permute.xlu1 %2847  ;;  %v1483_v60 = vpack.c.bf16 %v1414_v56, %v1414_v56 }
 0x332   : > { %v2850_v1 = vunpack.i.h.bf16 %v2848_v59  ;;  %v2849_v2 = vunpack.i.l.bf16 %v2848_v59  ;;  %v2888_v38 = vpop.eup %2887 }
 0x333   : > { %v1328_v3 = vpop.permute.xlu0 %1327  ;;  %2727 = vmatmul.mubr.msk.bf16.vlgmr.msra.gmra.mrb[28].mxu0 %vm1485_vm3, %v1477_v58  ;;  %v1582_v53 = vsel %vm1485_vm3, %v1483_v60, 0  ;;  %v1473_v39 = vsel %vm1459_vm5, %v2888_v38, 0.0 }
 0x334   : > { %v1337_v4 = vsel %vm1335_vm2, %v1284_v61, %v2849_v2  ;;  %2737 = vmatpush3.bf16.xpose.msra.mxu0 %v1582_v53  ;;  %v1415_v5 = vsel %vm1335_vm2, %v1367_v62, %v2850_v1  ;;  %2738 = vmatprep.mubr.msk.bf16.mxu0 %vm2919_vm1, %v2918_v9  ;;  %v1338_v11 = vsel %vm1335_vm2, %v1285_v0, %v1328_v3 }
 0x335   : > { %v1478_v63 = vpack.c.bf16 %v1337_v4, %v1337_v4  ;;  %v1278_v6 = vpop.permute.xlu1 %1277  ;;  %v1484_v7 = vpack.c.bf16 %v1415_v5, %v1415_v5  ;;  %2748 = vmatprep.subr.bf16.mxu0 %v2918_v9  ;;  %v1479_v18 = vpack.c.bf16 %v1338_v11, %v1338_v11 }
 0x336   : > { %v1286_v17 = vsub.f32 %v1258_v14, %v1278_v6  ;;  %v2890_v40 = vpop.eup %2889 }
 0x337   : > { %2733 = vmatmul.mubr.msk.bf16.vlgmr.msra.gmra.mrb[20].mxu1 %vm1485_vm3, %v1478_v63  ;;  %v1628_v16 = vsel %vm1485_vm3, %v1484_v7, 0  ;;  %v1474_v47 = vsel %vm1459_vm5, %v2890_v40, 0.0  ;;  %v2892_v48 = vpop.eup %2891 }
 0x338   : > { %2743 = vmatpush3.bf16.xpose.msra.mxu1 %v1628_v16  ;;  %2744 = vmatprep.mubr.msk.bf16.mxu1 %vm2919_vm1, %v2918_v9  ;;  %v1475_v56 = vsel %vm1459_vm5, %v2892_v48, 0.0  ;;  %v2894_v57 = vpop.eup %2893 }
 0x339   : > { %v1330_v19 = vpop.permute.xlu1 %1329  ;;  %2754 = vmatprep.subr.bf16.mxu1 %v2918_v9  ;;  %v1476_v2 = vsel %vm1459_vm5, %v2894_v57, 0.0 }
 0x33a   : > { %v1339_v20 = vsel %vm1335_vm2, %v1286_v17, %v1330_v19 }
 0x33b   : > { %2739 = vmatmul.mubr.msk.bf16.vlgmr.msra.gmra.mrb[32].mxu0 %vm1485_vm3, %v1479_v18  ;;  %v1480_v34 = vpack.c.bf16 %v1339_v20, %v1339_v20 }
 0x33c   : > { %2749 = vmatpush3.bf16.msra.mxu0 %v1687_v45  ;;  %2750 = vmatprep.mubr.msk.bf16.mxu0 %vm2919_vm1, %v2918_v9 }
 0x33d   : > { %2760 = vmatprep.subr.bf16.mxu0 %v2918_v9 }
 0x33f   : > { %2745 = vmatmul.mubr.msk.bf16.vlgmr.msra.gmra.mrb[24].mxu1 %vm1485_vm3, %v1480_v34 }
 0x340   : > { %2755 = vmatpush3.bf16.msra.mxu1 %v1733_v24  ;;  %2756 = vmatprep.mubr.msk.bf16.mxu1 %vm2919_vm1, %v2918_v9 }
 0x341   : > { %2766 = vmatprep.subr.bf16.mxu1 %v2918_v9 }
 0x406   : > { %v1526_v41 = vpop.f32.mrb[28].mxu0 }
 0x407   : > { %v1670_v43 = vmul.f32 %v1526_v41, %v1473_v39  ;;  %v2728_v8 = vpop.f32.mrb[29].mxu0 }
 0x408   : > { %v1529_v46 = vpop.f32.mrb[30].mxu0 }
 0x409   : > { %v1674_v49 = vpack.c.bf16 %v1670_v43, %v1670_v43  ;;  %v2729_v50 = vpop.f32.mrb[31].mxu0 }
 0x40a   : > { %v1572_v51 = vpop.f32.mrb[20].mxu1 }
 0x40b   : > { %v1671_v44 = vmul.f32 %v1572_v51, %v1474_v47  ;;  %v2734_v22 = vpop.f32.mrb[21].mxu1  ;;  %2751 = vmatmul.mubr.msk.bf16.vlgmr.msra.gmra.mrb[36].mxu0 %vm1485_vm3, %v1674_v49 }
 0x40c   : > { %2761 = vmatpush3.bf16.msra.mxu0 %v1779_v55  ;;  %v1575_v42 = vpop.f32.mrb[22].mxu1  ;;  %2762 = vmatprep.mubr.msk.bf16.mxu0 %vm2919_vm1, %v2918_v9  ;;  %v1996_v55 = vsel %vm1685_vm4, %v1988_v52, 0 }
 0x40d   : > { %v1675_v58 = vpack.c.bf16 %v1671_v44, %v1671_v44  ;;  %v2735_v59 = vpop.f32.mrb[23].mxu1  ;;  %2772 = vmatprep.subr.bf16.mxu0 %v2918_v9  ;;  %v1989_v44 = vld [vmem:[%s3514_s10 + $0x4] sm:$0xf] }
 0x40e   : > { %v1618_v60 = vpop.f32.mrb[32].mxu0  ;;  %v2042_v22 = vsel %vm1685_vm4, %v1989_v44, 0 }
 0x40f   : > { %v1672_v61 = vmul.f32 %v1618_v60, %v1475_v56  ;;  %v2740_v62 = vpop.f32.mrb[33].mxu0  ;;  %2757 = vmatmul.mubr.msk.bf16.vlgmr.msra.gmra.mrb[28].mxu1 %vm1485_vm3, %v1675_v58 }
 0x410   : > { %2767 = vmatpush3.bf16.msra.mxu1 %v1825_v23  ;;  %v1621_v1 = vpop.f32.mrb[34].mxu0  ;;  %2768 = vmatprep.mubr.msk.bf16.mxu1 %vm2919_vm1, %v2918_v9 }
 0x411   : > { %v1676_v3 = vpack.c.bf16 %v1672_v61, %v1672_v61  ;;  %v2741_v53 = vpop.f32.mrb[35].mxu0  ;;  %2778 = vmatprep.subr.bf16.mxu1 %v2918_v9 }
 0x412   : > { %v1664_v0 = vpop.f32.mrb[24].mxu1 }
 0x413   : > { %v1673_v4 = vmul.f32 %v1664_v0, %v1476_v2  ;;  %v2746_v5 = vpop.f32.mrb[25].mxu1  ;;  %2763 = vmatmul.mubr.msk.bf16.vlgmr.msra.gmra.mrb[40].mxu0 %vm1485_vm3, %v1676_v3  ;;  %v2527_v0 = vld [vmem:[%s3512_s8] ss:$0 sm:$0xff] }
 0x414   : > { %v1667_v63 = vpop.f32.mrb[26].mxu1  ;;  %2774 = vmatprep.mubr.msk.bf16.mxu0 %vm2919_vm1, %v2918_v9  ;;  %2773 = vmatpush3.bf16.msra.mxu0 %v1996_v55  ;;  %v2531_v5 = vld [vmem:[%s3513_s9] ss:$0 sm:$0xff] }
 0x415   : > { %v1677_v6 = vpack.c.bf16 %v1673_v4, %v1673_v4  ;;  %v2747_v7 = vpop.f32.mrb[27].mxu1  ;;  %2784 = vmatprep.subr.bf16.mxu0 %v2918_v9 }
 0x416   : > { %v1990_v7 = vld [vmem:[%s3514_s10 + $0x8] sm:$0xf] }
 0x417   : > { %2769 = vmatmul.mubr.msk.bf16.vlgmr.msra.gmra.mrb[32].mxu1 %vm1485_vm3, %v1677_v6 }
 0x418   : > { %2780 = vmatprep.mubr.msk.bf16.mxu1 %vm2919_vm1, %v2918_v9  ;;  %2779 = vmatpush3.bf16.msra.mxu1 %v2042_v22 }
 0x419   : > { %2790 = vmatprep.subr.bf16.mxu1 %v2918_v9 }
 0x4de   : > { %v1723_v11 = vpop.f32.mrb[36].mxu0 }
 0x4df   : > { %v2752_v14 = vpop.f32.mrb[37].mxu0  ;;  %v1867_v15 = vsel %vm1485_vm3, %v1723_v11, 0.0 }
 0x4e0   : > { %1868 = vadd.xlane.f32.xlu0 %v1867_v15  ;;  %v1726_v16 = vpop.f32.mrb[38].mxu0 }
 0x4e1   : > { %v2753_v17 = vpop.f32.mrb[39].mxu0  ;;  %v2532_v16 = vld [vmem:[%s3513_s9 + $0x1] ss:$0 sm:$0xff] }
 0x4e2   : > { %v1769_v18 = vpop.f32.mrb[28].mxu1 }
 0x4e3   : > { %v2758_v19 = vpop.f32.mrb[29].mxu1  ;;  %v1870_v20 = vsel %vm1485_vm3, %v1769_v18, 0.0 }
 0x4e4   : > { %1871 = vadd.xlane.f32.xlu1 %v1870_v20  ;;  %v1772_v12 = vpop.f32.mrb[30].mxu1 }
 0x4e5   : > { %v2759_v45 = vpop.f32.mrb[31].mxu1  ;;  %v1991_v12 = vld [vmem:[%s3514_s10 + $0xc] sm:$0xf] }
 0x4e6   : > { %v1815_v34 = vpop.f32.mrb[40].mxu0  ;;  %v2529_v45 = vld [vmem:[%s3512_s8 + $0x2] ss:$0 sm:$0xff] }
 0x4e7   : > { %v2764_v24 = vpop.f32.mrb[41].mxu0  ;;  %v1873_v10 = vsel %vm1485_vm3, %v1815_v34, 0.0 }
 0x4e8   : > { %1874 = vadd.xlane.f32.xlu0 %v1873_v10  ;;  %v1818_v25 = vpop.f32.mrb[42].mxu0  ;;  %v2533_v10 = vld [vmem:[%s3513_s9 + $0x2] ss:$0 sm:$0xff] }
 0x4e9   : > { %v2765_v26 = vpop.f32.mrb[43].mxu0 }
 0x4ea   : > { %v1861_v27 = vpop.f32.mrb[32].mxu1  ;;  %v2134_v26 = vsel %vm1685_vm4, %v1991_v12, 0  ;;  %v2880_v12 = vld [vmem:[%s3519_s15 + $0x18] sm:$0xff]  }
 0x4eb   : > { %v2770_v28 = vpop.f32.mrb[33].mxu1  ;;  %v1876_v29 = vsel %vm1485_vm3, %v1861_v27, 0.0 }
 0x4ec   : > { %v1864_v30 = vpop.f32.mrb[34].mxu1  ;;  %1877 = vadd.xlane.f32.xlu0 %v1876_v29  ;;  %v2530_v29 = vld [vmem:[%s3512_s8 + $0x3] ss:$0 sm:$0xff] }
 0x4ed   : > { %v2771_v31 = vpop.f32.mrb[35].mxu1 }
 0x56d   : > { %v1869_v21 = vpop.xlane.xlu0 %1868 }
 0x56e   : > { %v1880_v32 = vmul.f32 0.125, %v1869_v21  ;;  %v2534_v21 = vld [vmem:[%s3513_s9 + $0x3] ss:$0 sm:$0xff] }
 0x570   : > { %v1884_v33 = vsub.f32 %v1723_v11, %v1880_v32  ;;  %v2528_v11 = vld [vmem:[%s3512_s8 + $0x1] ss:$0 sm:$0xff] }
 0x571   : > { %v1872_v13 = vpop.xlane.xlu1 %1871 }
 0x572   : > { %v1881_v35 = vmul.f32 0.125, %v1872_v13  ;;  %v1888_v36 = vmul.f32 %v1884_v33, %v1884_v33 }
 0x574   : > { %v1885_v37 = vsub.f32 %v1769_v18, %v1881_v35  ;;  %v1892_v38 = vsel %vm1485_vm3, %v1888_v36, 0.0  ;;  %v2088_v18 = vsel %vm1685_vm4, %v1990_v7, 0  ;;  %v2539_v7 = vld [vmem:[%s3515_s11] ss:$0 sm:$0xff] }
 0x575   : > { %1893 = vadd.xlane.f32.xlu1 %v1892_v38  ;;  %v1875_v39 = vpop.xlane.xlu0 %1874 }
 0x576   : > { %v1882_v40 = vmul.f32 0.125, %v1875_v39  ;;  %v1889_v41 = vmul.f32 %v1885_v37, %v1885_v37 }
 0x578   : > { %v1886_v54 = vsub.f32 %v1815_v34, %v1882_v40  ;;  %v1895_v43 = vsel %vm1485_vm3, %v1889_v41, 0.0 }
 0x579   : > { %1896 = vadd.xlane.f32.xlu0 %v1895_v43  ;;  %v1878_v8 = vpop.xlane.xlu0 %1877 }
 0x57a   : > { %v1883_v46 = vmul.f32 0.125, %v1878_v8  ;;  %v1890_v47 = vmul.f32 %v1886_v54, %v1886_v54 }
 0x57c   : > { %v1887_v48 = vsub.f32 %v1861_v27, %v1883_v46  ;;  %v1898_v49 = vsel %vm1485_vm3, %v1890_v47, 0.0 }
 0x57d   : > { %1899 = vadd.xlane.f32.xlu1 %v1898_v49 }
 0x57e   : > { %v1891_v50 = vmul.f32 %v1887_v48, %v1887_v48 }
 0x580   : > { %v1901_v51 = vsel %vm1485_vm3, %v1891_v50, 0.0 }
 0x581   : > { %1902 = vadd.xlane.f32.xlu0 %v1901_v51 }
 0x602   : > { %v1894_v42 = vpop.xlane.xlu1 %1893 }
 0x603   : > { %v1904_v56 = vmul.f32 0.125, %v1894_v42 }
 0x605   : > { %v1908_v57 = vadd.f32 1e-05, %v1904_v56 }
 0x606   : > { %v1897_v58 = vpop.xlane.xlu0 %1896 }
 0x607   : > { %2895 = vrsqrt.f32 %v1908_v57  ;;  %v1905_v59 = vmul.f32 0.125, %v1897_v58 }
 0x609   : > { %v1909_v60 = vadd.f32 1e-05, %v1905_v59  ;;  %v2909_v59 = vld [vmem:[%s3028_s0] sm:$0xff] }
 0x60a   : > { %v1900_v23 = vpop.xlane.xlu1 %1899 }
 0x60b   : > { %2897 = vrsqrt.f32 %v1909_v60  ;;  %v1906_v61 = vmul.f32 0.125, %v1900_v23 }
 0x60d   : > { %v1910_v62 = vadd.f32 1e-05, %v1906_v61 }
 0x60e   : > { %v1903_v1 = vpop.xlane.xlu0 %1902 }
 0x60f   : > { %2899 = vrsqrt.f32 %v1910_v62  ;;  %v1907_v2 = vmul.f32 0.125, %v1903_v1 }
 0x611   : > { %v2896_v3 = vpop.eup %2895  ;;  %v1911_v53 = vadd.f32 1e-05, %v1907_v2 }
 0x612   : > { %v1916_v4 = vmul.f32 %v2896_v3, %v1884_v33 }
 0x613   : > { %2901 = vrsqrt.f32 %v1911_v53  ;;  %v2875_v53 = vld [vmem:[%s3517_s13] sm:$0xff]  }
 0x614   : > { %v1948_v63 = vmul.f32 %v2527_v0, %v1916_v4  ;;  %v2876_v0 = vld [vmem:[%s3517_s13 + $0x8] sm:$0xff]  }
 0x615   : > { %v2898_v6 = vpop.eup %2897 }
 0x616   : > { %v1917_v14 = vmul.f32 %v2898_v6, %v1885_v37  ;;  %v1980_v15 = vadd.f32 %v2531_v5, %v1948_v63 }
 0x618   : > { %v1984_v17 = vpack.c.bf16 %v1980_v15, %v1980_v15  ;;  %v1949_v19 = vmul.f32 %v2528_v11, %v1917_v14  ;;  %v2540_v14 = vld [vmem:[%s3516_s12] ss:$0 sm:$0xff] }
 0x619   : > { %v2900_v20 = vpop.eup %2899 }
 0x61a   : > { %v1918_v34 = vmul.f32 %v2900_v20, %v1886_v54  ;;  %2775 = vmatmul.mubr.msk.bf16.vlgmr.msra.gmra.mrb[44].mxu0 %vm1485_vm3, %v1984_v17  ;;  %v1981_v24 = vadd.f32 %v2532_v16, %v1949_v19  ;;  %v2878_v19 = vld [vmem:[%s3519_s15 + $0x8] sm:$0xff]   ;;  %v2879_v20 = vld [vmem:[%s3519_s15 + $0x10] sm:$0xff]  }
 0x61b   : > { %2785 = vmatpush3.bf16.msra.mxu0 %v2088_v18  ;;  %2786 = vmatprep.mubr.msk.bf16.mxu0 %vm2919_vm1, %v2918_v9  ;;  %v2877_v18 = vld [vmem:[%s3519_s15] sm:$0xff]  }
 0x61c   : > { %v1985_v25 = vpack.c.bf16 %v1981_v24, %v1981_v24  ;;  %v1950_v27 = vmul.f32 %v2529_v45, %v1918_v34  ;;  %2796 = vmatprep.subr.bf16.mxu0 %v2918_v9  ;;  %v2881_v45 = vld [vmem:[%s3519_s15 + $0x20] sm:$0xff]   ;;  %v2882_v34 = vld [vmem:[%s3519_s15 + $0x28] sm:$0xff]   ;;  %v2883_v24 = vld [vmem:[%s3519_s15 + $0x30] sm:$0xff]  }
 0x61d   : > { %v2902_v28 = vpop.eup %2901 }
 0x61e   : > { %v1919_v30 = vmul.f32 %v2902_v28, %v1887_v48  ;;  %2781 = vmatmul.mubr.msk.bf16.vlgmr.msra.gmra.mrb[36].mxu1 %vm1485_vm3, %v1985_v25  ;;  %v1982_v31 = vadd.f32 %v2533_v10, %v1950_v27  ;;  %v2884_v10 = vld [vmem:[%s3519_s15 + $0x38] sm:$0xff]   ;;  %v2541_v25 = vld [vmem:[%s3518_s14] ss:$0 sm:$0xff] }
 0x61f   : > { %2791 = vmatpush3.bf16.msra.mxu1 %v2134_v26  ;;  %2792 = vmatprep.mubr.msk.bf16.mxu1 %vm2919_vm1, %v2918_v9 }
 0x620   : > { %v1986_v32 = vpack.c.bf16 %v1982_v31, %v1982_v31  ;;  %v1951_v33 = vmul.f32 %v2530_v29, %v1919_v30  ;;  %2804 = vmatprep.subr.bf16.mxu1 %v2918_v9 }
 0x622   : > { %2787 = vmatmul.mubr.msk.bf16.vlgmr.msra.gmra.mrb[48].mxu0 %vm1485_vm3, %v1986_v32  ;;  %v1983_v13 = vadd.f32 %v2534_v21, %v1951_v33 }
 0x623   : > { %2800 = vmatprep.mubr.msk.bf16.mxu0 %vm2919_vm1, %v2918_v9  ;;  %2797 = vmatpush3.bf16.msra.mxu0 %v2875_v53 }
 0x624   : > { %v1987_v35 = vpack.c.bf16 %v1983_v13, %v1983_v13  ;;  %2798 = vmatprep.subr.bf16.mxu0 %v2918_v9 }
 0x626   : > { %2793 = vmatmul.mubr.msk.bf16.vlgmr.msra.gmra.mrb[40].mxu1 %vm1485_vm3, %v1987_v35 }
 0x627   : > { %2820 = vmatprep.mubr.msk.bf16.mxu1 %vm2919_vm1, %v2918_v9  ;;  %2799 = vmatpush3.bf16.msra.mxu0 %v2876_v0 }
 0x628   : > { %2805 = vmatpush3.bf16.msra.mxu1 %v2877_v18 }
 0x629   : > { %2806 = vmatprep.subr.bf16.mxu1 %v2918_v9 }
 0x62c   : > { %2807 = vmatpush3.bf16.msra.mxu1 %v2878_v19 }
 0x62d   : > { %2808 = vmatprep.subr.bf16.mxu1 %v2918_v9 }
 0x630   : > { %2809 = vmatpush3.bf16.msra.mxu1 %v2879_v20 }
 0x631   : > { %2810 = vmatprep.subr.bf16.mxu1 %v2918_v9 }
 0x634   : > { %2811 = vmatpush3.bf16.msra.mxu1 %v2880_v12 }
 0x635   : > { %2812 = vmatprep.subr.bf16.mxu1 %v2918_v9 }
 0x638   : > { %2813 = vmatpush3.bf16.msra.mxu1 %v2881_v45 }
 0x639   : > { %2814 = vmatprep.subr.bf16.mxu1 %v2918_v9 }
 0x63c   : > { %2815 = vmatpush3.bf16.msra.mxu1 %v2882_v34 }
 0x63d   : > { %2816 = vmatprep.subr.bf16.mxu1 %v2918_v9 }
 0x640   : > { %2817 = vmatpush3.bf16.msra.mxu1 %v2883_v24 }
 0x641   : > { %2818 = vmatprep.subr.bf16.mxu1 %v2918_v9 }
 0x644   : > { %2819 = vmatpush3.bf16.msra.mxu1 %v2884_v10 }
 0x6ed   : > { %v2032_v36 = vpop.f32.mrb[44].mxu0 }
 0x6ee   : > { %v2776_v37 = vpop.f32.mrb[45].mxu0  ;;  %v2176_v41 = vsel %vm548_vm0, %v2032_v36, 0.0 }
 0x6ef   : > { %v2035_v38 = vpop.f32.mrb[46].mxu0 }
 0x6f0   : > { %v2777_v39 = vpop.f32.mrb[47].mxu0 }
 0x6f1   : > { %v2078_v40 = vpop.f32.mrb[36].mxu1 }
 0x6f2   : > { %v2177_v54 = vsel %vm548_vm0, %v2078_v40, 0.0  ;;  %v2782_v43 = vpop.f32.mrb[37].mxu1 }
 0x6f3   : > { %v2178_v8 = vadd.f32 %v2177_v54, %v2176_v41  ;;  %v2081_v46 = vpop.f32.mrb[38].mxu1 }
 0x6f4   : > { %v2783_v47 = vpop.f32.mrb[39].mxu1 }
 0x6f5   : > { %v2124_v48 = vpop.f32.mrb[48].mxu0 }
 0x6f6   : > { %v2179_v49 = vsel %vm548_vm0, %v2124_v48, 0.0  ;;  %v2788_v50 = vpop.f32.mrb[49].mxu0 }
 0x6f7   : > { %v2180_v51 = vadd.f32 %v2179_v49, %v2178_v8  ;;  %v2127_v52 = vpop.f32.mrb[50].mxu0 }
 0x6f8   : > { %v2789_v55 = vpop.f32.mrb[51].mxu0 }
 0x6f9   : > { %v2170_v44 = vpop.f32.mrb[40].mxu1 }
 0x6fa   : > { %v2181_v22 = vsel %vm548_vm0, %v2170_v44, 0.0  ;;  %v2794_v42 = vpop.f32.mrb[41].mxu1 }
 0x6fb   : > { %v2182_v56 = vadd.f32 %v2181_v22, %v2180_v51  ;;  %v2173_v57 = vpop.f32.mrb[42].mxu1  ;;  %v2545_v42 = vld [vmem:[%s3520_s16] ss:$0 sm:$0xff] }
 0x6fc   : > { %v2795_v58 = vpop.f32.mrb[43].mxu1 }
 0x6fd   : > { %v3437_v60 = vadd.f32 %v2909_v59, %v2182_v56 }
 0x6ff   : > { %v2186_v23 = vsel %vm548_vm0, %v3437_v60, 0.0 }
 0x700   : > { %2187 = vadd.xlane.f32.xlu1 %v2186_v23 }
 0x78d   : > { %v2188_v61 = vpop.xlane.xlu1 %2187 }
 0x78e   : > { %v2189_v62 = vmul.f32 0.03125, %v2188_v61 }
 0x790   : > { %v2190_v1 = vsub.f32 %v3437_v60, %v2189_v62 }
 0x792   : > { %v2191_v2 = vmul.f32 %v2190_v1, %v2190_v1 }
 0x794   : > { %v2192_v3 = vsel %vm548_vm0, %v2191_v2, 0.0 }
 0x795   : > { %2193 = vadd.xlane.f32.xlu0 %v2192_v3 }
 0x822   : > { %v2194_v4 = vpop.xlane.xlu0 %2193 }
 0x823   : > { %v2195_v5 = vmul.f32 0.03125, %v2194_v4 }
 0x825   : > { %v2196_v63 = vadd.f32 1e-05, %v2195_v5 }
 0x827   : > { %2903 = vrsqrt.f32 %v2196_v63 }
 0x831   : > { %v2904_v6 = vpop.eup %2903 }
 0x832   : > { %v2198_v11 = vmul.f32 %v2904_v6, %v2190_v1 }
 0x834   : > { %v2205_v15 = vmul.f32 %v2539_v7, %v2198_v11 }
 0x836   : > { %v2212_v16 = vadd.f32 %v2540_v14, %v2205_v15 }
 0x838   : > { %v2213_v17 = vpack.c.bf16 %v2212_v16, %v2212_v16 }
 0x83a   : > { %2801 = vmatmul.mubr.msk.bf16.vlgmr.msra.gmra.mrb[52].mxu0 %vm548_vm0, %v2213_v17 }
 0x90d   : > { %v2274_v26 = vpop.f32.mrb[52].mxu0 }
 0x90e   : > { %v2275_v27 = vadd.f32 %v2541_v25, %v2274_v26  ;;  %v2802_v28 = vpop.f32.mrb[53].mxu0 }
 0x90f   : > { %v2277_v29 = vpop.f32.mrb[54].mxu0 }
 0x910   : > { %v2281_v30 = vmul.f32 0.70710677, %v2275_v27  ;;  %v2803_v31 = vpop.f32.mrb[55].mxu0  ;;  %v2280_v52 = vmul.f32 0.5, %v2275_v27 }
 0x912   : > { %v2282_v21 = vand.u32 2147483647, %v2281_v30  ;;  %vm2302_vm6 = vcmp.ge.f32.partialorder %v2281_v30, 0.0 }
 0x914   : > { %v2283_v32 = vmul.f32 0.3275911, %v2282_v21  ;;  %v2296_v9 = vsub.f32 0.0, %v2282_v21 }
 0x916   : > { %v2284_v33 = vadd.f32 1.0, %v2283_v32  ;;  %v2297_v35 = vmul.f32 %v2296_v9, %v2282_v21 }
 0x918   : > { %2905 = vrcp.f32 %v2284_v33  ;;  %v2298_v38 = vmul.f32 1.442695, %v2297_v35 }
 0x91a   : > { %2907 = vpow2.f32 %v2298_v38 }
 0x922   : > { %v2906_v13 = vpop.eup %2905 }
 0x923   : > { %v2287_v36 = vmul.f32 1.0614054, %v2906_v13 }
 0x924   : > { %v2908_v47 = vpop.eup %2907 }
 0x925   : > { %v2288_v37 = vadd.f32 -1.4531521, %v2287_v36 }
 0x927   : > { %v2289_v39 = vmul.f32 %v2906_v13, %v2288_v37 }
 0x929   : > { %v2290_v40 = vadd.f32 1.4214138, %v2289_v39 }
 0x92b   : > { %v2291_v41 = vmul.f32 %v2906_v13, %v2290_v40 }
 0x92d   : > { %v2292_v54 = vadd.f32 -0.28449672, %v2291_v41 }
 0x92f   : > { %v2293_v43 = vmul.f32 %v2906_v13, %v2292_v54 }
 0x931   : > { %v2294_v8 = vadd.f32 0.2548296, %v2293_v43 }
 0x933   : > { %v2295_v46 = vmul.f32 %v2906_v13, %v2294_v8 }
 0x935   : > { %v2300_v48 = vmul.f32 %v2908_v47, %v2295_v46 }
 0x937   : > { %v2301_v49 = vsub.f32 1.0, %v2300_v48 }
 0x939   : > { %v2303_v50 = vsub.f32 0.0, %v2301_v49 }
 0x93b   : > { %v2304_v51 = vsel %vm2302_vm6, %v2301_v49, %v2303_v50 }
 0x93c   : > { %v2305_v55 = vadd.f32 1.0, %v2304_v51 }
 0x93e   : > { %v2306_v44 = vmul.f32 %v2305_v55, %v2280_v52 }
 0x940   : > { %v2307_v22 = vpack.c.bf16 %v2306_v44, %v2306_v44 }
 0x942   : > { %2821 = vmatmul.mubr.bf16.vlgmr.msra.gmra.mrb[44].mxu1 %v2307_v22 }
 0xa15   : > { %v2413_v56 = vpop.f32.mrb[44].mxu1 }
 0xa16   : > { %v2414_v57 = vadd.f32 %v2545_v42, %v2413_v56  ;;  %v2822_v58 = vpop.f32.mrb[45].mxu1 }
 0xa17   : > { %v2416_v59 = vpop.f32.mrb[46].mxu1 }
 0xa18   : > { %v2419_v23 = vadd.f32 %v2414_v57, %v3437_v60  ;;  %v2823_v61 = vpop.f32.mrb[47].mxu1 }
 0xa1a   : > { %2420 = vst.msk [vmem:[%s543_s20] sm:$0xff] %vm548_vm0, %v2419_v23 }
 0xa1b PF: > { %s27_s24 = sadd.s32 1, %s2916_s24  }
 0xa1c   : > { %p24_p4 = scmp.ge.s32.totalorder %s27_s24, 4  }
 0xa1e   :  { %26 = sbr.rel (!%p24_p4) target bundleno = 3 (0x3), region = 118 }

</bundles_post_ra>
